<compile_context>
chip_gen: v7x
topology: tpu7x:2x2x1
jax: 0.10.0
libtpu: 0.0.40
codegen_flags: <defaults>
</compile_context>

<pallas_src>
import jax
import jax.numpy as jnp
from jax.experimental import pallas as pl
from jax.experimental.pallas import tpu as pltpu


_LANE_WIDTH = 1024          # lane-dense last dim (multiple of 128)
_ROWS_PER_BLOCK = 256       # 256 x 1024 x 4B = 1 MiB per f32 buffer
_MIN_PALLAS_ELEMS = 64 * 1024  # below this, plain jnp.tanh wins


def _tanh_kernel(x_ref, o_ref):
    # Elementwise tanh on the VMEM tile.  Compute in f32 (EUP path); cast
    # back to the output dtype (no-op for f32 inputs).
    x = x_ref[...]
    o_ref[...] = jnp.tanh(x.astype(jnp.float32)).astype(o_ref.dtype)


def tanh_pallas(x: jax.Array) -> jax.Array:
    """Apply tanh; semantics match torch.nn.Tanh()(x)."""
    orig_shape = x.shape
    orig_dtype = x.dtype
    n = x.size

    # Tiny inputs: Pallas call overhead is 10-100x the work -> use XLA.
    if n < _MIN_PALLAS_ELEMS:
        return jnp.tanh(x)

    L = _LANE_WIDTH
    r0 = pl.cdiv(n, L)                       # rows after padding to L
    if r0 >= _ROWS_PER_BLOCK:
        tr = _ROWS_PER_BLOCK
        rows = pl.cdiv(r0, tr) * tr          # rows padded to a block multiple
    else:
        rows = pl.cdiv(r0, 8) * 8            # keep sublane (8) alignment
        tr = rows                            # single block for moderate sizes

    total = rows * L
    flat = x.reshape(-1)
    pad = total - n
    if pad:
        flat = jnp.pad(flat, (0, pad))       # tanh(0) = 0, sliced off below
    x2 = flat.reshape(rows, L)

    grid = (rows // tr,)
    out = pl.pallas_call(
        _tanh_kernel,
        out_shape=jax.ShapeDtypeStruct((rows, L), orig_dtype),
        grid_spec=pltpu.PrefetchScalarGridSpec(
            num_scalar_prefetch=0,
            grid=grid,
            in_specs=[pl.BlockSpec((tr, L), lambda i: (i, 0))],
            out_specs=pl.BlockSpec((tr, L), lambda i: (i, 0)),
        ),
        compiler_params=pltpu.CompilerParams(
            dimension_semantics=("parallel",),     # megacore-shard on v7x
            vmem_limit_bytes=32 * 1024 * 1024,     # >> 2 bufs x (in+out) x 1 MiB
        ),
    )(x2)

    return out.reshape(-1)[:n].reshape(orig_shape)


if __name__ == "__main__":
    key = jax.random.PRNGKey(0)
    k1, k2 = jax.random.split(key)

    # fc3-style activation (small): takes the fast jnp.tanh fallback path.
    x_small = jax.random.normal(k1, (8, 32), dtype=jnp.float32)
    # Larger, unaligned activation: exercises the Pallas path
    # (lane-dense repack, padding, multi-block pipelined grid, slice-off).
    x_large = jax.random.normal(k2, (1000, 513), dtype=jnp.float32)

    y_small = tanh_pallas(x_small)
    y_large = tanh_pallas(x_large)
    jax.block_until_ready((y_small, y_large))

    for x, y in ((x_small, y_small), (x_large, y_large)):
        ref = jnp.tanh(x)
        assert y.shape == x.shape and y.dtype == x.dtype
        assert jnp.max(jnp.abs(y - ref)) < 1e-6

    print("KERNEL_OK")
</pallas_src>

<mosaic_0001>
module attributes {stable_mosaic.version = 11 : i64} {
  func.func @_tanh_kernel(%arg0: i32, %arg1: memref<256x1024xf32, #tpu.memory_space<vmem>>, %arg2: memref<256x1024xf32, #tpu.memory_space<vmem>>) attributes {dimension_semantics = [#tpu.dimension_semantics<parallel>], iteration_bounds = array<i64: 2>, scalar_prefetch = 0 : i64, scratch_operands = 0 : i64, tpu.core_type = #tpu.core_type<tc>, window_params = [{transform_indices = @transform_0, window_bounds = array<i64: 256, 1024>}, {transform_indices = @transform_1, window_bounds = array<i64: 256, 1024>}]} {
    %c0 = arith.constant 0 : index
    %c0_0 = arith.constant 0 : index
    %0 = vector.load %arg1[%c0, %c0_0] : memref<256x1024xf32, #tpu.memory_space<vmem>>, vector<256x1024xf32>
    %1 = math.tanh %0 : vector<256x1024xf32>
    %c0_1 = arith.constant 0 : index
    %c0_2 = arith.constant 0 : index
    %2 = vector.load %arg2[%c0_1, %c0_2] : memref<256x1024xf32, #tpu.memory_space<vmem>>, vector<256x1024xf32>
    tpu.vector_store %arg2[%c0_1, %c0_2], %1 {strides = array<i32>} : memref<256x1024xf32, #tpu.memory_space<vmem>>, vector<256x1024xf32>,
    return
  }
  func.func @transform_0(%arg0: i32) -> (i32, i32) {
    %c0_i32 = arith.constant 0 : i32
    %c0_i32_0 = arith.constant 0 : i32
    return %arg0, %c0_i32 : i32, i32
  }
  func.func @transform_1(%arg0: i32) -> (i32, i32) {
    %c0_i32 = arith.constant 0 : i32
    %c0_i32_0 = arith.constant 0 : i32
    return %arg0, %c0_i32 : i32, i32
  }
}

</mosaic_0001>

<bundles_post_ra>
// kernel: tpu_custom_call.1
= control target key start
LH: loop header
LB: loop body
LE: loop exit
PB: predicated region body
PF: predicated region fallthrough
CT: control target
= control target key end

     0   :  { %6 = vsyncpa [#allocation3], 0  ;;  %s2373_s0 = inlined_call_operand.hbm [shape: f32[512,1024], index: 0, kind: input, shape index: {}]   ;;  %s2374_s1 = inlined_call_operand.hbm [shape: f32[512,1024], index: 1, kind: output, shape index: {}]  }
   0x1   :  { %8 = vsyncpa [#allocation3 + $0x1], 0 }
   0x2   :  { %9 = vsyncpa [#allocation4], 0 }
   0x3   :  { %11 = vsyncpa [#allocation4 + $0x1], 0  ;;  %s1690_s6 = smov 0   ;;  %s1692_s7 = smov 0  }
   0x4   :  { %s1694_s8 = smov 0   ;;  %s1696_s9 = smov 0  }
   0x5 LB: > { %s1711_s10 = sadd.s32 4294967295, %s1672_s9   ;;  %s994_s11 = sadd.s32 4294967294, %s1672_s9   ;;  %s1672_s9 = sphi %s1696_s9, %s2387_s9   ;;  %s1668_s8 = sphi %s1694_s8, %s2386_s8   ;;  %s1664_s7 = sphi %s1692_s7, %s2385_s7   ;;  %s1660_s6 = sphi %s1690_s6, %s2384_s6  }
   0x6   : > { %s1715_s12 = sadd.s32 1, %s1672_s9   ;;  %s24_s13 = sadd.s32 1, %s1668_s8 }
   0x7   : > { %s21_s14 = ssub.s32 %s1672_s9, %s1715_s12  ;;  %p31_p0 = scmp.ne.s32.totalorder %s1668_s8, %s1664_s7 }
   0x8   : > { %p22_p1 = scmp.eq.s32.totalorder %s21_s14, 0  ;;  %p32_p2 = scmp.eq.s32.totalorder %s1672_s9, 0 }
   0x9   : > { %p37_p3 = scmp.ne.s32.totalorder %s1664_s7, %s1660_s6  ;;  %p38_p4 = scmp.eq.s32.totalorder %s1711_s10, 0 }
   0xa   : > { %s1727_s15 = scalar_select %p22_p1, %s1668_s8, %s24_s13  }
   0xb   : > { %p1729_p5 = por %p32_p2, %p31_p0  ;;  %p1733_p6 = por %p38_p4, %p37_p3 }
   0xc   : > { %p61_p7 = scmp.eq.s32.totalorder %s1711_s10, 1  ;;  %p67_p8 = scmp.eq.s32.totalorder %s994_s11, 1 }
   0xd   : > { %p1026_p10 = scmp.lt.s32.totalorder %s1672_s9, 2  ;;  %s87_s20 = sand.u32 1, %s1668_s8  }
   0xe   : > { %p1740_p11 = por %p61_p7, %p31_p0  ;;  %p1744_p12 = por %p67_p8, %p37_p3 }
   0xf   : > { %s1011_s21 = sshll.u32 %s1672_s9, 15  ;;  %s997_s22 = sshll.u32 %s87_s20, 11 }
  0x10   : > { %s2378_s18 = scalar_select %p1740_p11, 1, 0 }
  0x11   : > { %s2379_s19 = scalar_select %p1744_p12, 1, 0 }
  0x12   : > { %s1753_s25 = scalar_lea.hbm %s2373_s0, %s1011_s21  ;;  %s91_s26 = scalar_lea.vmem [#allocation2], %s997_s22 }
  0x13   : > { %s99_s27 = sshll.u32 %s91_s26, 4  ;;  %p1757_p13 = pnand %p1026_p10, %p1729_p5  ;;  %s1761_s27 = int_to_ptr.vmem [resolvable:$true] %s99_s27 }
  0x14   : > { %s1763_s29 = scalar_lea.sflag [#allocation3], %s87_s20  ;;  %s1576_s30 = scalar_lea.hbm %s1753_s25, 32768 }
  0x15   : > { %p1577_p0 = scmp.ne.s32.totalorder %s1753_s25, %s1576_s30  ;;  %p1578_p1 = pneg %p1757_p13 }
  0x16   : > { %s1581_s4 = scalar_lea.hbm %s2373_s0, 65536  ;;  %p1582_p4 = scmp.lt.u32.totalorder %s1753_s25, %s2373_s0 }
  0x17   : > { %p1579_p2 = pnand %p1578_p1, %p1577_p0  ;;  %p1583_p5 = scmp.lt.u32.totalorder %s1581_s4, %s1576_s30 }
  0x18   : > { %p1585_p8 = scmp.lt.u32.totalorder %s1576_s30, %s1753_s25 }
  0x19   : > { %p1580_p3 = pneg %p1579_p2  ;;  %p1584_p7 = por %p1583_p5, %p1582_p4 }
  0x1b   : > { %p1586_p10 = por %p1585_p8, %p1584_p7 }
  0x1d   : > { %p1587_p9 = pnand %p1586_p10, %p1580_p3 }
  0x1f   : > { %1590 = shalt.err (!%p1587_p9)
}
  0x20   : > { %s1591_s13 = scalar_lea.vmem %s1761_s27, 32768  ;;  %s1674_s14 = smov [#allocation2]  }
  0x21   : > { %p1592_p0 = scmp.ne.s32.totalorder %s1761_s27, %s1591_s13  ;;  %s1596_s16 = sshll.u32 %s1674_s14, 4  ;;  %s1597_s16 = int_to_ptr.vmem [resolvable:$false] %s1596_s16 }
  0x22   : > { %s1598_s20 = scalar_lea.vmem %s1597_s16, 65536  ;;  %p1599_p11 = scmp.lt.s32.totalorder %s1761_s27, %s1597_s16 }
  0x23   : > { %p1594_p2 = pnand %p1592_p0, %p1578_p1  ;;  %p1600_p4 = scmp.lt.s32.totalorder %s1598_s20, %s1591_s13 }
  0x25   : > { %p1595_p12 = pneg %p1594_p2  ;;  %p1601_p5 = por %p1600_p4, %p1599_p11 }
  0x27   : > { %p1602_p7 = pnand %p1601_p5, %p1595_p12 }
  0x29   : > { %1605 = shalt.err (!%p1602_p7)
}
  0x2a   : > { %s1675_s21 = smov 1024   ;;  %s1676_s22 = smov 64  }
  0x2b   : > { %1021 = dma.hbm_to_vmem [thread:$0]  (!%p1757_p13), %s1753_s25, 32768, %s1761_s27, %s1763_s29, %s1675_s21, %s1675_s21, %s1676_s22  }
  0x2c   : > { %p1001_p9 = scmp.ge.s32.totalorder %s1672_s9, 1  ;;  %p107_p1 = scmp.lt.s32.totalorder %s1672_s9, 3 }
  0x2e   : > { %p108_p3 = pnand %p1001_p9, %p107_p1 }
  0x2f   : > { %s1794_s23 = sand.u32 (!%p108_p3), 1, %s1664_s7  }
  0x30   : > { %111 = sbr.rel (%p108_p3) target bundleno = 338 (0x152), region = 24  ;;  %s1002_s24 = sshll.u32 (!%p108_p3), %s1794_s23, 11 }
  0x31   : > { %s114_s26 = scalar_lea.sflag (!%p108_p3), [#allocation3], %s1794_s23  ;;  %s1800_s30 = scalar_lea.vmem (!%p108_p3), [#allocation2], %s1002_s24 }
  0x37   : > { %1651 = dma.done.wait (%p1733_p6), %s114_s26, 32768  }
  0x38   : > { %1653 = vsyncadd (%p1733_p6), %s114_s26, 4294934528  ;;  %v138_v0 = vld [vmem:[%s1800_s30] sm:$0xff]  ;;  %v139_v1 = vld [vmem:[%s1800_s30 + $0x8] sm:$0xff]  ;;  %s1822_s17 = scalar_lea.vmem [#allocation5], %s1002_s24  ;;  %s1013_s25 = sshll.u32 %s1711_s10, 15 }
  0x39   : > { %v140_v2 = vld [vmem:[%s1800_s30 + $0x10] sm:$0xff]  ;;  %1064 = vtanh.f32 %v138_v0  ;;  %v141_v3 = vld [vmem:[%s1800_s30 + $0x18] sm:$0xff]  ;;  %v142_v4 = vld [vmem:[%s1800_s30 + $0x20] sm:$0xff]  ;;  %s921_s27 = sshll.u32 %s1822_s17, 4  ;;  %s2324_s2 = scalar_lea.hbm %s2374_s1, %s1013_s25  ;;  %s2326_s27 = int_to_ptr.vmem [resolvable:$true] %s921_s27 }
  0x3a   : > { %1066 = vtanh.f32 %v139_v1  ;;  %v143_v5 = vld [vmem:[%s1800_s30 + $0x28] sm:$0xff]  ;;  %v144_v6 = vld [vmem:[%s1800_s30 + $0x30] sm:$0xff]  ;;  %v145_v7 = vld [vmem:[%s1800_s30 + $0x38] sm:$0xff]  ;;  %s907_s10 = scalar_lea.sflag [#allocation4], %s1794_s23  ;;  %s1606_s3 = scalar_lea.vmem %s2326_s27, 32768 }
  0x3b   : > { %1068 = vtanh.f32 %v140_v2  ;;  %v146_v8 = vld [vmem:[%s1800_s30 + $0x40] sm:$0xff]  ;;  %v147_v9 = vld [vmem:[%s1800_s30 + $0x48] sm:$0xff]  ;;  %v148_v10 = vld [vmem:[%s1800_s30 + $0x50] sm:$0xff]  ;;  %p1607_p6 = scmp.ne.s32.totalorder %s2326_s27, %s1606_s3  ;;  %p2381_p11 = scmp.ne.s32.totalorder %s2378_s18, 0 }
  0x3c   : > { %1070 = vtanh.f32 %v141_v3  ;;  %v149_v11 = vld [vmem:[%s1800_s30 + $0x58] sm:$0xff]  ;;  %v150_v12 = vld [vmem:[%s1800_s30 + $0x60] sm:$0xff]  ;;  %v151_v14 = vld [vmem:[%s1800_s30 + $0x68] sm:$0xff]  ;;  %s1677_s4 = smov [#allocation5]  }
  0x3d   : > { %1072 = vtanh.f32 %v142_v4  ;;  %v152_v16 = vld [vmem:[%s1800_s30 + $0x70] sm:$0xff]  ;;  %v153_v18 = vld [vmem:[%s1800_s30 + $0x78] sm:$0xff]  ;;  %v154_v20 = vld [vmem:[%s1800_s30 + $0x80] sm:$0xff]  ;;  %p1608_p12 = pnand %p1607_p6, %p2381_p11  ;;  %s1610_s5 = sshll.u32 %s1677_s4, 4  ;;  %s1611_s5 = int_to_ptr.vmem [resolvable:$false] %s1610_s5 }
  0x3e   : > { %1074 = vtanh.f32 %v143_v5  ;;  %v155_v22 = vld [vmem:[%s1800_s30 + $0x88] sm:$0xff]  ;;  %v156_v24 = vld [vmem:[%s1800_s30 + $0x90] sm:$0xff]  ;;  %v157_v26 = vld [vmem:[%s1800_s30 + $0x98] sm:$0xff]  ;;  %s1612_s11 = scalar_lea.vmem %s1611_s5, 65536  ;;  %p1613_p8 = scmp.lt.s32.totalorder %s2326_s27, %s1611_s5 }
  0x3f   : > { %1076 = vtanh.f32 %v144_v6  ;;  %v158_v28 = vld [vmem:[%s1800_s30 + $0xa0] sm:$0xff]  ;;  %v159_v30 = vld [vmem:[%s1800_s30 + $0xa8] sm:$0xff]  ;;  %v160_v32 = vld [vmem:[%s1800_s30 + $0xb0] sm:$0xff]  ;;  %p1609_p13 = pneg %p1608_p12  ;;  %p1614_p10 = scmp.lt.s32.totalorder %s1612_s11, %s1606_s3 }
  0x40   : > { %1078 = vtanh.f32 %v145_v7  ;;  %v161_v34 = vld [vmem:[%s1800_s30 + $0xb8] sm:$0xff]  ;;  %v162_v36 = vld [vmem:[%s1800_s30 + $0xc0] sm:$0xff]  ;;  %v163_v38 = vld [vmem:[%s1800_s30 + $0xc8] sm:$0xff] }
  0x41   : > { %1080 = vtanh.f32 %v146_v8  ;;  %v164_v40 = vld [vmem:[%s1800_s30 + $0xd0] sm:$0xff]  ;;  %v165_v42 = vld [vmem:[%s1800_s30 + $0xd8] sm:$0xff]  ;;  %v166_v44 = vld [vmem:[%s1800_s30 + $0xe0] sm:$0xff]  ;;  %p1615_p0 = por %p1614_p10, %p1613_p8 }
  0x42   : > { %1082 = vtanh.f32 %v147_v9  ;;  %v167_v46 = vld [vmem:[%s1800_s30 + $0xe8] sm:$0xff]  ;;  %v168_v48 = vld [vmem:[%s1800_s30 + $0xf0] sm:$0xff]  ;;  %v169_v50 = vld [vmem:[%s1800_s30 + $0xf8] sm:$0xff] }
  0x43   : > { %v1065_v13 = vpop.eup %1064  ;;  %1084 = vtanh.f32 %v148_v10  ;;  %v170_v52 = vld [vmem:[%s1800_s30 + $0x100] sm:$0xff]  ;;  %v171_v54 = vld [vmem:[%s1800_s30 + $0x108] sm:$0xff]  ;;  %v172_v56 = vld [vmem:[%s1800_s30 + $0x110] sm:$0xff]  ;;  %p1616_p2 = pnand %p1615_p0, %p1609_p13 }
  0x44   : > { %v1067_v15 = vpop.eup %1066  ;;  %650 = vst [vmem:[%s1822_s17] sm:$0xff] %v1065_v13  ;;  %1086 = vtanh.f32 %v149_v11  ;;  %v173_v58 = vld [vmem:[%s1800_s30 + $0x118] sm:$0xff]  ;;  %v174_v60 = vld [vmem:[%s1800_s30 + $0x120] sm:$0xff]  ;;  %v175_v62 = vld [vmem:[%s1800_s30 + $0x128] sm:$0xff] }
  0x45   : > { %v1069_v17 = vpop.eup %1068  ;;  %651 = vst [vmem:[%s1822_s17 + $0x8] sm:$0xff] %v1067_v15  ;;  %1088 = vtanh.f32 %v150_v12  ;;  %v176_v0 = vld [vmem:[%s1800_s30 + $0x130] sm:$0xff]  ;;  %v177_v2 = vld [vmem:[%s1800_s30 + $0x138] sm:$0xff]  ;;  %v178_v4 = vld [vmem:[%s1800_s30 + $0x140] sm:$0xff] }
  0x46   : > { %v1071_v19 = vpop.eup %1070  ;;  %652 = vst [vmem:[%s1822_s17 + $0x10] sm:$0xff] %v1069_v17  ;;  %1090 = vtanh.f32 %v151_v14  ;;  %v179_v6 = vld [vmem:[%s1800_s30 + $0x148] sm:$0xff]  ;;  %v180_v8 = vld [vmem:[%s1800_s30 + $0x150] sm:$0xff]  ;;  %v181_v10 = vld [vmem:[%s1800_s30 + $0x158] sm:$0xff] }
  0x47   : > { %v1073_v21 = vpop.eup %1072  ;;  %653 = vst [vmem:[%s1822_s17 + $0x18] sm:$0xff] %v1071_v19  ;;  %1092 = vtanh.f32 %v152_v16  ;;  %v182_v12 = vld [vmem:[%s1800_s30 + $0x160] sm:$0xff]  ;;  %v183_v14 = vld [vmem:[%s1800_s30 + $0x168] sm:$0xff]  ;;  %v184_v16 = vld [vmem:[%s1800_s30 + $0x170] sm:$0xff] }
  0x48   : > { %v1075_v23 = vpop.eup %1074  ;;  %654 = vst [vmem:[%s1822_s17 + $0x20] sm:$0xff] %v1073_v21  ;;  %1094 = vtanh.f32 %v153_v18  ;;  %v185_v18 = vld [vmem:[%s1800_s30 + $0x178] sm:$0xff] }
  0x49   : > { %v1077_v25 = vpop.eup %1076  ;;  %655 = vst [vmem:[%s1822_s17 + $0x28] sm:$0xff] %v1075_v23  ;;  %1096 = vtanh.f32 %v154_v20  ;;  %v186_v20 = vld [vmem:[%s1800_s30 + $0x180] sm:$0xff] }
  0x4a   : > { %v1079_v27 = vpop.eup %1078  ;;  %656 = vst [vmem:[%s1822_s17 + $0x30] sm:$0xff] %v1077_v25  ;;  %1098 = vtanh.f32 %v155_v22  ;;  %v187_v22 = vld [vmem:[%s1800_s30 + $0x188] sm:$0xff] }
  0x4b   : > { %v1081_v29 = vpop.eup %1080  ;;  %657 = vst [vmem:[%s1822_s17 + $0x38] sm:$0xff] %v1079_v27  ;;  %1100 = vtanh.f32 %v156_v24  ;;  %v188_v24 = vld [vmem:[%s1800_s30 + $0x190] sm:$0xff] }
  0x4c   : > { %v1083_v31 = vpop.eup %1082  ;;  %658 = vst [vmem:[%s1822_s17 + $0x40] sm:$0xff] %v1081_v29  ;;  %1102 = vtanh.f32 %v157_v26  ;;  %v189_v26 = vld [vmem:[%s1800_s30 + $0x198] sm:$0xff] }
  0x4d   : > { %v1085_v33 = vpop.eup %1084  ;;  %659 = vst [vmem:[%s1822_s17 + $0x48] sm:$0xff] %v1083_v31  ;;  %1104 = vtanh.f32 %v158_v28  ;;  %v190_v28 = vld [vmem:[%s1800_s30 + $0x1a0] sm:$0xff] }
  0x4e   : > { %v1087_v35 = vpop.eup %1086  ;;  %660 = vst [vmem:[%s1822_s17 + $0x50] sm:$0xff] %v1085_v33  ;;  %1106 = vtanh.f32 %v159_v30  ;;  %v191_v30 = vld [vmem:[%s1800_s30 + $0x1a8] sm:$0xff] }
  0x4f   : > { %v1089_v37 = vpop.eup %1088  ;;  %661 = vst [vmem:[%s1822_s17 + $0x58] sm:$0xff] %v1087_v35  ;;  %1108 = vtanh.f32 %v160_v32  ;;  %v192_v32 = vld [vmem:[%s1800_s30 + $0x1b0] sm:$0xff] }
  0x50   : > { %v1091_v39 = vpop.eup %1090  ;;  %662 = vst [vmem:[%s1822_s17 + $0x60] sm:$0xff] %v1089_v37  ;;  %1110 = vtanh.f32 %v161_v34  ;;  %v193_v34 = vld [vmem:[%s1800_s30 + $0x1b8] sm:$0xff] }
  0x51   : > { %v1093_v41 = vpop.eup %1092  ;;  %663 = vst [vmem:[%s1822_s17 + $0x68] sm:$0xff] %v1091_v39  ;;  %1112 = vtanh.f32 %v162_v36  ;;  %v194_v36 = vld [vmem:[%s1800_s30 + $0x1c0] sm:$0xff] }
  0x52   : > { %v1095_v43 = vpop.eup %1094  ;;  %664 = vst [vmem:[%s1822_s17 + $0x70] sm:$0xff] %v1093_v41  ;;  %1114 = vtanh.f32 %v163_v38  ;;  %v195_v38 = vld [vmem:[%s1800_s30 + $0x1c8] sm:$0xff] }
  0x53   : > { %v1097_v45 = vpop.eup %1096  ;;  %665 = vst [vmem:[%s1822_s17 + $0x78] sm:$0xff] %v1095_v43  ;;  %1116 = vtanh.f32 %v164_v40  ;;  %v196_v40 = vld [vmem:[%s1800_s30 + $0x1d0] sm:$0xff] }
  0x54   : > { %v1099_v47 = vpop.eup %1098  ;;  %666 = vst [vmem:[%s1822_s17 + $0x80] sm:$0xff] %v1097_v45  ;;  %1118 = vtanh.f32 %v165_v42  ;;  %v197_v42 = vld [vmem:[%s1800_s30 + $0x1d8] sm:$0xff] }
  0x55   : > { %v1101_v49 = vpop.eup %1100  ;;  %667 = vst [vmem:[%s1822_s17 + $0x88] sm:$0xff] %v1099_v47  ;;  %1120 = vtanh.f32 %v166_v44  ;;  %v198_v44 = vld [vmem:[%s1800_s30 + $0x1e0] sm:$0xff] }
  0x56   : > { %v1103_v51 = vpop.eup %1102  ;;  %668 = vst [vmem:[%s1822_s17 + $0x90] sm:$0xff] %v1101_v49  ;;  %1122 = vtanh.f32 %v167_v46  ;;  %v199_v46 = vld [vmem:[%s1800_s30 + $0x1e8] sm:$0xff] }
  0x57   : > { %v1105_v53 = vpop.eup %1104  ;;  %669 = vst [vmem:[%s1822_s17 + $0x98] sm:$0xff] %v1103_v51  ;;  %1124 = vtanh.f32 %v168_v48  ;;  %v200_v48 = vld [vmem:[%s1800_s30 + $0x1f0] sm:$0xff] }
  0x58   : > { %v1107_v55 = vpop.eup %1106  ;;  %670 = vst [vmem:[%s1822_s17 + $0xa0] sm:$0xff] %v1105_v53  ;;  %1126 = vtanh.f32 %v169_v50  ;;  %v201_v50 = vld [vmem:[%s1800_s30 + $0x1f8] sm:$0xff] }
  0x59   : > { %v1109_v57 = vpop.eup %1108  ;;  %671 = vst [vmem:[%s1822_s17 + $0xa8] sm:$0xff] %v1107_v55  ;;  %1128 = vtanh.f32 %v170_v52  ;;  %v202_v52 = vld [vmem:[%s1800_s30 + $0x200] sm:$0xff] }
  0x5a   : > { %v1111_v59 = vpop.eup %1110  ;;  %672 = vst [vmem:[%s1822_s17 + $0xb0] sm:$0xff] %v1109_v57  ;;  %1130 = vtanh.f32 %v171_v54  ;;  %v203_v54 = vld [vmem:[%s1800_s30 + $0x208] sm:$0xff] }
  0x5b   : > { %v1113_v61 = vpop.eup %1112  ;;  %673 = vst [vmem:[%s1822_s17 + $0xb8] sm:$0xff] %v1111_v59  ;;  %1132 = vtanh.f32 %v172_v56  ;;  %v204_v56 = vld [vmem:[%s1800_s30 + $0x210] sm:$0xff] }
  0x5c   : > { %v1115_v63 = vpop.eup %1114  ;;  %674 = vst [vmem:[%s1822_s17 + $0xc0] sm:$0xff] %v1113_v61  ;;  %1134 = vtanh.f32 %v173_v58  ;;  %v205_v58 = vld [vmem:[%s1800_s30 + $0x218] sm:$0xff] }
  0x5d   : > { %v1117_v1 = vpop.eup %1116  ;;  %675 = vst [vmem:[%s1822_s17 + $0xc8] sm:$0xff] %v1115_v63  ;;  %1136 = vtanh.f32 %v174_v60  ;;  %v206_v60 = vld [vmem:[%s1800_s30 + $0x220] sm:$0xff] }
  0x5e   : > { %v1119_v3 = vpop.eup %1118  ;;  %676 = vst [vmem:[%s1822_s17 + $0xd0] sm:$0xff] %v1117_v1  ;;  %1138 = vtanh.f32 %v175_v62  ;;  %v207_v62 = vld [vmem:[%s1800_s30 + $0x228] sm:$0xff] }
  0x5f   : > { %v1121_v5 = vpop.eup %1120  ;;  %677 = vst [vmem:[%s1822_s17 + $0xd8] sm:$0xff] %v1119_v3  ;;  %1140 = vtanh.f32 %v176_v0  ;;  %v208_v0 = vld [vmem:[%s1800_s30 + $0x230] sm:$0xff] }
  0x60   : > { %v1123_v7 = vpop.eup %1122  ;;  %678 = vst [vmem:[%s1822_s17 + $0xe0] sm:$0xff] %v1121_v5  ;;  %1142 = vtanh.f32 %v177_v2  ;;  %v209_v2 = vld [vmem:[%s1800_s30 + $0x238] sm:$0xff] }
  0x61   : > { %v1125_v9 = vpop.eup %1124  ;;  %679 = vst [vmem:[%s1822_s17 + $0xe8] sm:$0xff] %v1123_v7  ;;  %1144 = vtanh.f32 %v178_v4  ;;  %v210_v4 = vld [vmem:[%s1800_s30 + $0x240] sm:$0xff] }
  0x62   : > { %v1127_v11 = vpop.eup %1126  ;;  %680 = vst [vmem:[%s1822_s17 + $0xf0] sm:$0xff] %v1125_v9  ;;  %1146 = vtanh.f32 %v179_v6  ;;  %v211_v6 = vld [vmem:[%s1800_s30 + $0x248] sm:$0xff] }
  0x63   : > { %v1129_v13 = vpop.eup %1128  ;;  %681 = vst [vmem:[%s1822_s17 + $0xf8] sm:$0xff] %v1127_v11  ;;  %1148 = vtanh.f32 %v180_v8  ;;  %v212_v8 = vld [vmem:[%s1800_s30 + $0x250] sm:$0xff] }
  0x64   : > { %v1131_v15 = vpop.eup %1130  ;;  %682 = vst [vmem:[%s1822_s17 + $0x100] sm:$0xff] %v1129_v13  ;;  %1150 = vtanh.f32 %v181_v10  ;;  %v213_v10 = vld [vmem:[%s1800_s30 + $0x258] sm:$0xff] }
  0x65   : > { %v1133_v17 = vpop.eup %1132  ;;  %683 = vst [vmem:[%s1822_s17 + $0x108] sm:$0xff] %v1131_v15  ;;  %1152 = vtanh.f32 %v182_v12  ;;  %v214_v12 = vld [vmem:[%s1800_s30 + $0x260] sm:$0xff] }
  0x66   : > { %v1135_v19 = vpop.eup %1134  ;;  %684 = vst [vmem:[%s1822_s17 + $0x110] sm:$0xff] %v1133_v17  ;;  %1154 = vtanh.f32 %v183_v14  ;;  %v215_v14 = vld [vmem:[%s1800_s30 + $0x268] sm:$0xff] }
  0x67   : > { %v1137_v21 = vpop.eup %1136  ;;  %685 = vst [vmem:[%s1822_s17 + $0x118] sm:$0xff] %v1135_v19  ;;  %1156 = vtanh.f32 %v184_v16  ;;  %v216_v16 = vld [vmem:[%s1800_s30 + $0x270] sm:$0xff] }
  0x68   : > { %v1139_v23 = vpop.eup %1138  ;;  %686 = vst [vmem:[%s1822_s17 + $0x120] sm:$0xff] %v1137_v21  ;;  %1158 = vtanh.f32 %v185_v18  ;;  %v217_v18 = vld [vmem:[%s1800_s30 + $0x278] sm:$0xff] }
  0x69   : > { %v1141_v25 = vpop.eup %1140  ;;  %687 = vst [vmem:[%s1822_s17 + $0x128] sm:$0xff] %v1139_v23  ;;  %1160 = vtanh.f32 %v186_v20  ;;  %v218_v20 = vld [vmem:[%s1800_s30 + $0x280] sm:$0xff] }
  0x6a   : > { %v1143_v27 = vpop.eup %1142  ;;  %688 = vst [vmem:[%s1822_s17 + $0x130] sm:$0xff] %v1141_v25  ;;  %1162 = vtanh.f32 %v187_v22  ;;  %v219_v22 = vld [vmem:[%s1800_s30 + $0x288] sm:$0xff] }
  0x6b   : > { %v1145_v29 = vpop.eup %1144  ;;  %689 = vst [vmem:[%s1822_s17 + $0x138] sm:$0xff] %v1143_v27  ;;  %1164 = vtanh.f32 %v188_v24  ;;  %v220_v24 = vld [vmem:[%s1800_s30 + $0x290] sm:$0xff] }
  0x6c   : > { %v1147_v31 = vpop.eup %1146  ;;  %690 = vst [vmem:[%s1822_s17 + $0x140] sm:$0xff] %v1145_v29  ;;  %1166 = vtanh.f32 %v189_v26  ;;  %v221_v26 = vld [vmem:[%s1800_s30 + $0x298] sm:$0xff] }
  0x6d   : > { %v1149_v33 = vpop.eup %1148  ;;  %691 = vst [vmem:[%s1822_s17 + $0x148] sm:$0xff] %v1147_v31  ;;  %1168 = vtanh.f32 %v190_v28  ;;  %v222_v28 = vld [vmem:[%s1800_s30 + $0x2a0] sm:$0xff] }
  0x6e   : > { %v1151_v35 = vpop.eup %1150  ;;  %692 = vst [vmem:[%s1822_s17 + $0x150] sm:$0xff] %v1149_v33  ;;  %1170 = vtanh.f32 %v191_v30  ;;  %v223_v30 = vld [vmem:[%s1800_s30 + $0x2a8] sm:$0xff] }
  0x6f   : > { %v1153_v37 = vpop.eup %1152  ;;  %693 = vst [vmem:[%s1822_s17 + $0x158] sm:$0xff] %v1151_v35  ;;  %1172 = vtanh.f32 %v192_v32  ;;  %v224_v32 = vld [vmem:[%s1800_s30 + $0x2b0] sm:$0xff] }
  0x70   : > { %v1155_v39 = vpop.eup %1154  ;;  %694 = vst [vmem:[%s1822_s17 + $0x160] sm:$0xff] %v1153_v37  ;;  %1174 = vtanh.f32 %v193_v34  ;;  %v225_v34 = vld [vmem:[%s1800_s30 + $0x2b8] sm:$0xff] }
  0x71   : > { %v1157_v41 = vpop.eup %1156  ;;  %695 = vst [vmem:[%s1822_s17 + $0x168] sm:$0xff] %v1155_v39  ;;  %1176 = vtanh.f32 %v194_v36  ;;  %v226_v36 = vld [vmem:[%s1800_s30 + $0x2c0] sm:$0xff] }
  0x72   : > { %v1159_v43 = vpop.eup %1158  ;;  %696 = vst [vmem:[%s1822_s17 + $0x170] sm:$0xff] %v1157_v41  ;;  %1178 = vtanh.f32 %v195_v38  ;;  %v227_v38 = vld [vmem:[%s1800_s30 + $0x2c8] sm:$0xff] }
  0x73   : > { %v1161_v45 = vpop.eup %1160  ;;  %697 = vst [vmem:[%s1822_s17 + $0x178] sm:$0xff] %v1159_v43  ;;  %1180 = vtanh.f32 %v196_v40  ;;  %v228_v40 = vld [vmem:[%s1800_s30 + $0x2d0] sm:$0xff] }
  0x74   : > { %v1163_v47 = vpop.eup %1162  ;;  %698 = vst [vmem:[%s1822_s17 + $0x180] sm:$0xff] %v1161_v45  ;;  %1182 = vtanh.f32 %v197_v42  ;;  %v229_v42 = vld [vmem:[%s1800_s30 + $0x2d8] sm:$0xff] }
  0x75   : > { %v1165_v49 = vpop.eup %1164  ;;  %699 = vst [vmem:[%s1822_s17 + $0x188] sm:$0xff] %v1163_v47  ;;  %1184 = vtanh.f32 %v198_v44  ;;  %v230_v44 = vld [vmem:[%s1800_s30 + $0x2e0] sm:$0xff] }
  0x76   : > { %v1167_v51 = vpop.eup %1166  ;;  %700 = vst [vmem:[%s1822_s17 + $0x190] sm:$0xff] %v1165_v49  ;;  %1186 = vtanh.f32 %v199_v46  ;;  %v231_v46 = vld [vmem:[%s1800_s30 + $0x2e8] sm:$0xff] }
  0x77   : > { %v1169_v53 = vpop.eup %1168  ;;  %701 = vst [vmem:[%s1822_s17 + $0x198] sm:$0xff] %v1167_v51  ;;  %1188 = vtanh.f32 %v200_v48  ;;  %v232_v48 = vld [vmem:[%s1800_s30 + $0x2f0] sm:$0xff] }
  0x78   : > { %v1171_v55 = vpop.eup %1170  ;;  %702 = vst [vmem:[%s1822_s17 + $0x1a0] sm:$0xff] %v1169_v53  ;;  %1190 = vtanh.f32 %v201_v50  ;;  %v233_v50 = vld [vmem:[%s1800_s30 + $0x2f8] sm:$0xff] }
  0x79   : > { %v1173_v57 = vpop.eup %1172  ;;  %703 = vst [vmem:[%s1822_s17 + $0x1a8] sm:$0xff] %v1171_v55  ;;  %1192 = vtanh.f32 %v202_v52  ;;  %v234_v52 = vld [vmem:[%s1800_s30 + $0x300] sm:$0xff] }
  0x7a   : > { %v1175_v59 = vpop.eup %1174  ;;  %704 = vst [vmem:[%s1822_s17 + $0x1b0] sm:$0xff] %v1173_v57  ;;  %1194 = vtanh.f32 %v203_v54  ;;  %v235_v54 = vld [vmem:[%s1800_s30 + $0x308] sm:$0xff] }
  0x7b   : > { %v1177_v61 = vpop.eup %1176  ;;  %705 = vst [vmem:[%s1822_s17 + $0x1b8] sm:$0xff] %v1175_v59  ;;  %1196 = vtanh.f32 %v204_v56  ;;  %v236_v56 = vld [vmem:[%s1800_s30 + $0x310] sm:$0xff] }
  0x7c   : > { %v1179_v63 = vpop.eup %1178  ;;  %706 = vst [vmem:[%s1822_s17 + $0x1c0] sm:$0xff] %v1177_v61  ;;  %1198 = vtanh.f32 %v205_v58  ;;  %v237_v58 = vld [vmem:[%s1800_s30 + $0x318] sm:$0xff] }
  0x7d   : > { %v1181_v1 = vpop.eup %1180  ;;  %707 = vst [vmem:[%s1822_s17 + $0x1c8] sm:$0xff] %v1179_v63  ;;  %1200 = vtanh.f32 %v206_v60  ;;  %v238_v60 = vld [vmem:[%s1800_s30 + $0x320] sm:$0xff] }
  0x7e   : > { %v1183_v3 = vpop.eup %1182  ;;  %708 = vst [vmem:[%s1822_s17 + $0x1d0] sm:$0xff] %v1181_v1  ;;  %1202 = vtanh.f32 %v207_v62  ;;  %v239_v62 = vld [vmem:[%s1800_s30 + $0x328] sm:$0xff] }
  0x7f   : > { %v1185_v5 = vpop.eup %1184  ;;  %709 = vst [vmem:[%s1822_s17 + $0x1d8] sm:$0xff] %v1183_v3  ;;  %1204 = vtanh.f32 %v208_v0  ;;  %v240_v0 = vld [vmem:[%s1800_s30 + $0x330] sm:$0xff] }
  0x80   : > { %v1187_v7 = vpop.eup %1186  ;;  %710 = vst [vmem:[%s1822_s17 + $0x1e0] sm:$0xff] %v1185_v5  ;;  %1206 = vtanh.f32 %v209_v2  ;;  %v241_v2 = vld [vmem:[%s1800_s30 + $0x338] sm:$0xff] }
  0x81   : > { %v1189_v9 = vpop.eup %1188  ;;  %711 = vst [vmem:[%s1822_s17 + $0x1e8] sm:$0xff] %v1187_v7  ;;  %1208 = vtanh.f32 %v210_v4  ;;  %v242_v4 = vld [vmem:[%s1800_s30 + $0x340] sm:$0xff] }
  0x82   : > { %v1191_v11 = vpop.eup %1190  ;;  %712 = vst [vmem:[%s1822_s17 + $0x1f0] sm:$0xff] %v1189_v9  ;;  %1210 = vtanh.f32 %v211_v6  ;;  %v243_v6 = vld [vmem:[%s1800_s30 + $0x348] sm:$0xff] }
  0x83   : > { %v1193_v13 = vpop.eup %1192  ;;  %713 = vst [vmem:[%s1822_s17 + $0x1f8] sm:$0xff] %v1191_v11  ;;  %1212 = vtanh.f32 %v212_v8  ;;  %v244_v8 = vld [vmem:[%s1800_s30 + $0x350] sm:$0xff] }
  0x84   : > { %v1195_v15 = vpop.eup %1194  ;;  %714 = vst [vmem:[%s1822_s17 + $0x200] sm:$0xff] %v1193_v13  ;;  %1214 = vtanh.f32 %v213_v10  ;;  %v245_v10 = vld [vmem:[%s1800_s30 + $0x358] sm:$0xff] }
  0x85   : > { %v1197_v17 = vpop.eup %1196  ;;  %715 = vst [vmem:[%s1822_s17 + $0x208] sm:$0xff] %v1195_v15  ;;  %1216 = vtanh.f32 %v214_v12  ;;  %v246_v12 = vld [vmem:[%s1800_s30 + $0x360] sm:$0xff] }
  0x86   : > { %v1199_v19 = vpop.eup %1198  ;;  %716 = vst [vmem:[%s1822_s17 + $0x210] sm:$0xff] %v1197_v17  ;;  %1218 = vtanh.f32 %v215_v14  ;;  %v247_v14 = vld [vmem:[%s1800_s30 + $0x368] sm:$0xff] }
  0x87   : > { %v1201_v21 = vpop.eup %1200  ;;  %717 = vst [vmem:[%s1822_s17 + $0x218] sm:$0xff] %v1199_v19  ;;  %1220 = vtanh.f32 %v216_v16  ;;  %v248_v16 = vld [vmem:[%s1800_s30 + $0x370] sm:$0xff] }
  0x88   : > { %v1203_v23 = vpop.eup %1202  ;;  %718 = vst [vmem:[%s1822_s17 + $0x220] sm:$0xff] %v1201_v21  ;;  %1222 = vtanh.f32 %v217_v18  ;;  %v249_v18 = vld [vmem:[%s1800_s30 + $0x378] sm:$0xff] }
  0x89   : > { %v1205_v25 = vpop.eup %1204  ;;  %719 = vst [vmem:[%s1822_s17 + $0x228] sm:$0xff] %v1203_v23  ;;  %1224 = vtanh.f32 %v218_v20  ;;  %v250_v20 = vld [vmem:[%s1800_s30 + $0x380] sm:$0xff] }
  0x8a   : > { %v1207_v27 = vpop.eup %1206  ;;  %720 = vst [vmem:[%s1822_s17 + $0x230] sm:$0xff] %v1205_v25  ;;  %1226 = vtanh.f32 %v219_v22  ;;  %v251_v22 = vld [vmem:[%s1800_s30 + $0x388] sm:$0xff] }
  0x8b   : > { %v1209_v29 = vpop.eup %1208  ;;  %721 = vst [vmem:[%s1822_s17 + $0x238] sm:$0xff] %v1207_v27  ;;  %1228 = vtanh.f32 %v220_v24  ;;  %v252_v24 = vld [vmem:[%s1800_s30 + $0x390] sm:$0xff] }
  0x8c   : > { %v1211_v31 = vpop.eup %1210  ;;  %722 = vst [vmem:[%s1822_s17 + $0x240] sm:$0xff] %v1209_v29  ;;  %1230 = vtanh.f32 %v221_v26  ;;  %v253_v26 = vld [vmem:[%s1800_s30 + $0x398] sm:$0xff] }
  0x8d   : > { %v1213_v33 = vpop.eup %1212  ;;  %723 = vst [vmem:[%s1822_s17 + $0x248] sm:$0xff] %v1211_v31  ;;  %1232 = vtanh.f32 %v222_v28  ;;  %v254_v28 = vld [vmem:[%s1800_s30 + $0x3a0] sm:$0xff] }
  0x8e   : > { %v1215_v35 = vpop.eup %1214  ;;  %724 = vst [vmem:[%s1822_s17 + $0x250] sm:$0xff] %v1213_v33  ;;  %1234 = vtanh.f32 %v223_v30  ;;  %v255_v30 = vld [vmem:[%s1800_s30 + $0x3a8] sm:$0xff] }
  0x8f   : > { %v1217_v37 = vpop.eup %1216  ;;  %725 = vst [vmem:[%s1822_s17 + $0x258] sm:$0xff] %v1215_v35  ;;  %1236 = vtanh.f32 %v224_v32  ;;  %v256_v32 = vld [vmem:[%s1800_s30 + $0x3b0] sm:$0xff] }
  0x90   : > { %v1219_v39 = vpop.eup %1218  ;;  %726 = vst [vmem:[%s1822_s17 + $0x260] sm:$0xff] %v1217_v37  ;;  %1238 = vtanh.f32 %v225_v34  ;;  %v257_v34 = vld [vmem:[%s1800_s30 + $0x3b8] sm:$0xff] }
  0x91   : > { %v1221_v41 = vpop.eup %1220  ;;  %727 = vst [vmem:[%s1822_s17 + $0x268] sm:$0xff] %v1219_v39  ;;  %1240 = vtanh.f32 %v226_v36  ;;  %v258_v36 = vld [vmem:[%s1800_s30 + $0x3c0] sm:$0xff] }
  0x92   : > { %v1223_v43 = vpop.eup %1222  ;;  %728 = vst [vmem:[%s1822_s17 + $0x270] sm:$0xff] %v1221_v41  ;;  %1242 = vtanh.f32 %v227_v38  ;;  %v259_v38 = vld [vmem:[%s1800_s30 + $0x3c8] sm:$0xff] }
  0x93   : > { %v1225_v45 = vpop.eup %1224  ;;  %729 = vst [vmem:[%s1822_s17 + $0x278] sm:$0xff] %v1223_v43  ;;  %1244 = vtanh.f32 %v228_v40  ;;  %v260_v40 = vld [vmem:[%s1800_s30 + $0x3d0] sm:$0xff] }
  0x94   : > { %v1227_v47 = vpop.eup %1226  ;;  %730 = vst [vmem:[%s1822_s17 + $0x280] sm:$0xff] %v1225_v45  ;;  %1246 = vtanh.f32 %v229_v42  ;;  %v261_v42 = vld [vmem:[%s1800_s30 + $0x3d8] sm:$0xff] }
  0x95   : > { %v1229_v49 = vpop.eup %1228  ;;  %731 = vst [vmem:[%s1822_s17 + $0x288] sm:$0xff] %v1227_v47  ;;  %1248 = vtanh.f32 %v230_v44  ;;  %v262_v44 = vld [vmem:[%s1800_s30 + $0x3e0] sm:$0xff] }
  0x96   : > { %v1231_v51 = vpop.eup %1230  ;;  %732 = vst [vmem:[%s1822_s17 + $0x290] sm:$0xff] %v1229_v49  ;;  %1250 = vtanh.f32 %v231_v46  ;;  %v263_v46 = vld [vmem:[%s1800_s30 + $0x3e8] sm:$0xff] }
  0x97   : > { %v1233_v53 = vpop.eup %1232  ;;  %733 = vst [vmem:[%s1822_s17 + $0x298] sm:$0xff] %v1231_v51  ;;  %1252 = vtanh.f32 %v232_v48  ;;  %v264_v48 = vld [vmem:[%s1800_s30 + $0x3f0] sm:$0xff] }
  0x98   : > { %v1235_v55 = vpop.eup %1234  ;;  %734 = vst [vmem:[%s1822_s17 + $0x2a0] sm:$0xff] %v1233_v53  ;;  %1254 = vtanh.f32 %v233_v50  ;;  %v265_v50 = vld [vmem:[%s1800_s30 + $0x3f8] sm:$0xff] }
  0x99   : > { %v1237_v57 = vpop.eup %1236  ;;  %735 = vst [vmem:[%s1822_s17 + $0x2a8] sm:$0xff] %v1235_v55  ;;  %1256 = vtanh.f32 %v234_v52  ;;  %v266_v52 = vld [vmem:[%s1800_s30 + $0x400] sm:$0xff] }
  0x9a   : > { %v1239_v59 = vpop.eup %1238  ;;  %736 = vst [vmem:[%s1822_s17 + $0x2b0] sm:$0xff] %v1237_v57  ;;  %1258 = vtanh.f32 %v235_v54  ;;  %v267_v54 = vld [vmem:[%s1800_s30 + $0x408] sm:$0xff] }
  0x9b   : > { %v1241_v61 = vpop.eup %1240  ;;  %737 = vst [vmem:[%s1822_s17 + $0x2b8] sm:$0xff] %v1239_v59  ;;  %1260 = vtanh.f32 %v236_v56  ;;  %v268_v56 = vld [vmem:[%s1800_s30 + $0x410] sm:$0xff] }
  0x9c   : > { %v1243_v63 = vpop.eup %1242  ;;  %738 = vst [vmem:[%s1822_s17 + $0x2c0] sm:$0xff] %v1241_v61  ;;  %1262 = vtanh.f32 %v237_v58  ;;  %v269_v58 = vld [vmem:[%s1800_s30 + $0x418] sm:$0xff] }
  0x9d   : > { %v1245_v1 = vpop.eup %1244  ;;  %739 = vst [vmem:[%s1822_s17 + $0x2c8] sm:$0xff] %v1243_v63  ;;  %1264 = vtanh.f32 %v238_v60  ;;  %v270_v60 = vld [vmem:[%s1800_s30 + $0x420] sm:$0xff] }
  0x9e   : > { %v1247_v3 = vpop.eup %1246  ;;  %740 = vst [vmem:[%s1822_s17 + $0x2d0] sm:$0xff] %v1245_v1  ;;  %1266 = vtanh.f32 %v239_v62  ;;  %v271_v62 = vld [vmem:[%s1800_s30 + $0x428] sm:$0xff] }
  0x9f   : > { %v1249_v5 = vpop.eup %1248  ;;  %741 = vst [vmem:[%s1822_s17 + $0x2d8] sm:$0xff] %v1247_v3  ;;  %1268 = vtanh.f32 %v240_v0  ;;  %v272_v0 = vld [vmem:[%s1800_s30 + $0x430] sm:$0xff] }
  0xa0   : > { %v1251_v7 = vpop.eup %1250  ;;  %742 = vst [vmem:[%s1822_s17 + $0x2e0] sm:$0xff] %v1249_v5  ;;  %1270 = vtanh.f32 %v241_v2  ;;  %v273_v2 = vld [vmem:[%s1800_s30 + $0x438] sm:$0xff] }
  0xa1   : > { %v1253_v9 = vpop.eup %1252  ;;  %743 = vst [vmem:[%s1822_s17 + $0x2e8] sm:$0xff] %v1251_v7  ;;  %1272 = vtanh.f32 %v242_v4  ;;  %v274_v4 = vld [vmem:[%s1800_s30 + $0x440] sm:$0xff] }
  0xa2   : > { %v1255_v11 = vpop.eup %1254  ;;  %744 = vst [vmem:[%s1822_s17 + $0x2f0] sm:$0xff] %v1253_v9  ;;  %1274 = vtanh.f32 %v243_v6  ;;  %v275_v6 = vld [vmem:[%s1800_s30 + $0x448] sm:$0xff] }
  0xa3   : > { %v1257_v13 = vpop.eup %1256  ;;  %745 = vst [vmem:[%s1822_s17 + $0x2f8] sm:$0xff] %v1255_v11  ;;  %1276 = vtanh.f32 %v244_v8  ;;  %v276_v8 = vld [vmem:[%s1800_s30 + $0x450] sm:$0xff] }
  0xa4   : > { %v1259_v15 = vpop.eup %1258  ;;  %746 = vst [vmem:[%s1822_s17 + $0x300] sm:$0xff] %v1257_v13  ;;  %1278 = vtanh.f32 %v245_v10  ;;  %v277_v10 = vld [vmem:[%s1800_s30 + $0x458] sm:$0xff] }
  0xa5   : > { %v1261_v17 = vpop.eup %1260  ;;  %747 = vst [vmem:[%s1822_s17 + $0x308] sm:$0xff] %v1259_v15  ;;  %1280 = vtanh.f32 %v246_v12  ;;  %v278_v12 = vld [vmem:[%s1800_s30 + $0x460] sm:$0xff] }
  0xa6   : > { %v1263_v19 = vpop.eup %1262  ;;  %748 = vst [vmem:[%s1822_s17 + $0x310] sm:$0xff] %v1261_v17  ;;  %1282 = vtanh.f32 %v247_v14  ;;  %v279_v14 = vld [vmem:[%s1800_s30 + $0x468] sm:$0xff] }
  0xa7   : > { %v1265_v21 = vpop.eup %1264  ;;  %749 = vst [vmem:[%s1822_s17 + $0x318] sm:$0xff] %v1263_v19  ;;  %1284 = vtanh.f32 %v248_v16  ;;  %v280_v16 = vld [vmem:[%s1800_s30 + $0x470] sm:$0xff] }
  0xa8   : > { %v1267_v23 = vpop.eup %1266  ;;  %750 = vst [vmem:[%s1822_s17 + $0x320] sm:$0xff] %v1265_v21  ;;  %1286 = vtanh.f32 %v249_v18  ;;  %v281_v18 = vld [vmem:[%s1800_s30 + $0x478] sm:$0xff] }
  0xa9   : > { %v1269_v25 = vpop.eup %1268  ;;  %751 = vst [vmem:[%s1822_s17 + $0x328] sm:$0xff] %v1267_v23  ;;  %1288 = vtanh.f32 %v250_v20  ;;  %v282_v20 = vld [vmem:[%s1800_s30 + $0x480] sm:$0xff] }
  0xaa   : > { %v1271_v27 = vpop.eup %1270  ;;  %752 = vst [vmem:[%s1822_s17 + $0x330] sm:$0xff] %v1269_v25  ;;  %1290 = vtanh.f32 %v251_v22  ;;  %v283_v22 = vld [vmem:[%s1800_s30 + $0x488] sm:$0xff] }
  0xab   : > { %v1273_v29 = vpop.eup %1272  ;;  %753 = vst [vmem:[%s1822_s17 + $0x338] sm:$0xff] %v1271_v27  ;;  %1292 = vtanh.f32 %v252_v24  ;;  %v284_v24 = vld [vmem:[%s1800_s30 + $0x490] sm:$0xff] }
  0xac   : > { %v1275_v31 = vpop.eup %1274  ;;  %754 = vst [vmem:[%s1822_s17 + $0x340] sm:$0xff] %v1273_v29  ;;  %1294 = vtanh.f32 %v253_v26  ;;  %v285_v26 = vld [vmem:[%s1800_s30 + $0x498] sm:$0xff] }
  0xad   : > { %v1277_v33 = vpop.eup %1276  ;;  %755 = vst [vmem:[%s1822_s17 + $0x348] sm:$0xff] %v1275_v31  ;;  %1296 = vtanh.f32 %v254_v28  ;;  %v286_v28 = vld [vmem:[%s1800_s30 + $0x4a0] sm:$0xff] }
  0xae   : > { %v1279_v35 = vpop.eup %1278  ;;  %756 = vst [vmem:[%s1822_s17 + $0x350] sm:$0xff] %v1277_v33  ;;  %1298 = vtanh.f32 %v255_v30  ;;  %v287_v30 = vld [vmem:[%s1800_s30 + $0x4a8] sm:$0xff] }
  0xaf   : > { %v1281_v37 = vpop.eup %1280  ;;  %757 = vst [vmem:[%s1822_s17 + $0x358] sm:$0xff] %v1279_v35  ;;  %1300 = vtanh.f32 %v256_v32  ;;  %v288_v32 = vld [vmem:[%s1800_s30 + $0x4b0] sm:$0xff] }
  0xb0   : > { %v1283_v39 = vpop.eup %1282  ;;  %758 = vst [vmem:[%s1822_s17 + $0x360] sm:$0xff] %v1281_v37  ;;  %1302 = vtanh.f32 %v257_v34  ;;  %v289_v34 = vld [vmem:[%s1800_s30 + $0x4b8] sm:$0xff] }
  0xb1   : > { %v1285_v41 = vpop.eup %1284  ;;  %759 = vst [vmem:[%s1822_s17 + $0x368] sm:$0xff] %v1283_v39  ;;  %1304 = vtanh.f32 %v258_v36  ;;  %v290_v36 = vld [vmem:[%s1800_s30 + $0x4c0] sm:$0xff] }
  0xb2   : > { %v1287_v43 = vpop.eup %1286  ;;  %760 = vst [vmem:[%s1822_s17 + $0x370] sm:$0xff] %v1285_v41  ;;  %1306 = vtanh.f32 %v259_v38  ;;  %v291_v38 = vld [vmem:[%s1800_s30 + $0x4c8] sm:$0xff] }
  0xb3   : > { %v1289_v45 = vpop.eup %1288  ;;  %761 = vst [vmem:[%s1822_s17 + $0x378] sm:$0xff] %v1287_v43  ;;  %1308 = vtanh.f32 %v260_v40  ;;  %v292_v40 = vld [vmem:[%s1800_s30 + $0x4d0] sm:$0xff] }
  0xb4   : > { %v1291_v47 = vpop.eup %1290  ;;  %762 = vst [vmem:[%s1822_s17 + $0x380] sm:$0xff] %v1289_v45  ;;  %1310 = vtanh.f32 %v261_v42  ;;  %v293_v42 = vld [vmem:[%s1800_s30 + $0x4d8] sm:$0xff] }
  0xb5   : > { %v1293_v49 = vpop.eup %1292  ;;  %763 = vst [vmem:[%s1822_s17 + $0x388] sm:$0xff] %v1291_v47  ;;  %1312 = vtanh.f32 %v262_v44  ;;  %v294_v44 = vld [vmem:[%s1800_s30 + $0x4e0] sm:$0xff] }
  0xb6   : > { %v1295_v51 = vpop.eup %1294  ;;  %764 = vst [vmem:[%s1822_s17 + $0x390] sm:$0xff] %v1293_v49  ;;  %1314 = vtanh.f32 %v263_v46  ;;  %v295_v46 = vld [vmem:[%s1800_s30 + $0x4e8] sm:$0xff] }
  0xb7   : > { %v1297_v53 = vpop.eup %1296  ;;  %765 = vst [vmem:[%s1822_s17 + $0x398] sm:$0xff] %v1295_v51  ;;  %1316 = vtanh.f32 %v264_v48  ;;  %v296_v48 = vld [vmem:[%s1800_s30 + $0x4f0] sm:$0xff] }
  0xb8   : > { %v1299_v55 = vpop.eup %1298  ;;  %766 = vst [vmem:[%s1822_s17 + $0x3a0] sm:$0xff] %v1297_v53  ;;  %1318 = vtanh.f32 %v265_v50  ;;  %v297_v50 = vld [vmem:[%s1800_s30 + $0x4f8] sm:$0xff] }
  0xb9   : > { %v1301_v57 = vpop.eup %1300  ;;  %767 = vst [vmem:[%s1822_s17 + $0x3a8] sm:$0xff] %v1299_v55  ;;  %1320 = vtanh.f32 %v266_v52  ;;  %v298_v52 = vld [vmem:[%s1800_s30 + $0x500] sm:$0xff] }
  0xba   : > { %v1303_v59 = vpop.eup %1302  ;;  %768 = vst [vmem:[%s1822_s17 + $0x3b0] sm:$0xff] %v1301_v57  ;;  %1322 = vtanh.f32 %v267_v54  ;;  %v299_v54 = vld [vmem:[%s1800_s30 + $0x508] sm:$0xff] }
  0xbb   : > { %v1305_v61 = vpop.eup %1304  ;;  %769 = vst [vmem:[%s1822_s17 + $0x3b8] sm:$0xff] %v1303_v59  ;;  %1324 = vtanh.f32 %v268_v56  ;;  %v300_v56 = vld [vmem:[%s1800_s30 + $0x510] sm:$0xff] }
  0xbc   : > { %v1307_v63 = vpop.eup %1306  ;;  %770 = vst [vmem:[%s1822_s17 + $0x3c0] sm:$0xff] %v1305_v61  ;;  %1326 = vtanh.f32 %v269_v58  ;;  %v301_v58 = vld [vmem:[%s1800_s30 + $0x518] sm:$0xff] }
  0xbd   : > { %v1309_v1 = vpop.eup %1308  ;;  %771 = vst [vmem:[%s1822_s17 + $0x3c8] sm:$0xff] %v1307_v63  ;;  %1328 = vtanh.f32 %v270_v60  ;;  %v302_v60 = vld [vmem:[%s1800_s30 + $0x520] sm:$0xff] }
  0xbe   : > { %v1311_v3 = vpop.eup %1310  ;;  %772 = vst [vmem:[%s1822_s17 + $0x3d0] sm:$0xff] %v1309_v1  ;;  %1330 = vtanh.f32 %v271_v62  ;;  %v303_v62 = vld [vmem:[%s1800_s30 + $0x528] sm:$0xff] }
  0xbf   : > { %v1313_v5 = vpop.eup %1312  ;;  %773 = vst [vmem:[%s1822_s17 + $0x3d8] sm:$0xff] %v1311_v3  ;;  %1332 = vtanh.f32 %v272_v0  ;;  %v304_v0 = vld [vmem:[%s1800_s30 + $0x530] sm:$0xff] }
  0xc0   : > { %v1315_v7 = vpop.eup %1314  ;;  %774 = vst [vmem:[%s1822_s17 + $0x3e0] sm:$0xff] %v1313_v5  ;;  %1334 = vtanh.f32 %v273_v2  ;;  %v305_v2 = vld [vmem:[%s1800_s30 + $0x538] sm:$0xff] }
  0xc1   : > { %v1317_v9 = vpop.eup %1316  ;;  %775 = vst [vmem:[%s1822_s17 + $0x3e8] sm:$0xff] %v1315_v7  ;;  %1336 = vtanh.f32 %v274_v4  ;;  %v306_v4 = vld [vmem:[%s1800_s30 + $0x540] sm:$0xff] }
  0xc2   : > { %v1319_v11 = vpop.eup %1318  ;;  %776 = vst [vmem:[%s1822_s17 + $0x3f0] sm:$0xff] %v1317_v9  ;;  %1338 = vtanh.f32 %v275_v6  ;;  %v307_v6 = vld [vmem:[%s1800_s30 + $0x548] sm:$0xff] }
  0xc3   : > { %v1321_v13 = vpop.eup %1320  ;;  %777 = vst [vmem:[%s1822_s17 + $0x3f8] sm:$0xff] %v1319_v11  ;;  %1340 = vtanh.f32 %v276_v8  ;;  %v308_v8 = vld [vmem:[%s1800_s30 + $0x550] sm:$0xff] }
  0xc4   : > { %v1323_v15 = vpop.eup %1322  ;;  %778 = vst [vmem:[%s1822_s17 + $0x400] sm:$0xff] %v1321_v13  ;;  %1342 = vtanh.f32 %v277_v10  ;;  %v309_v10 = vld [vmem:[%s1800_s30 + $0x558] sm:$0xff] }
  0xc5   : > { %v1325_v17 = vpop.eup %1324  ;;  %779 = vst [vmem:[%s1822_s17 + $0x408] sm:$0xff] %v1323_v15  ;;  %1344 = vtanh.f32 %v278_v12  ;;  %v310_v12 = vld [vmem:[%s1800_s30 + $0x560] sm:$0xff] }
  0xc6   : > { %v1327_v19 = vpop.eup %1326  ;;  %780 = vst [vmem:[%s1822_s17 + $0x410] sm:$0xff] %v1325_v17  ;;  %1346 = vtanh.f32 %v279_v14  ;;  %v311_v14 = vld [vmem:[%s1800_s30 + $0x568] sm:$0xff] }
  0xc7   : > { %v1329_v21 = vpop.eup %1328  ;;  %781 = vst [vmem:[%s1822_s17 + $0x418] sm:$0xff] %v1327_v19  ;;  %1348 = vtanh.f32 %v280_v16  ;;  %v312_v16 = vld [vmem:[%s1800_s30 + $0x570] sm:$0xff] }
  0xc8   : > { %v1331_v23 = vpop.eup %1330  ;;  %782 = vst [vmem:[%s1822_s17 + $0x420] sm:$0xff] %v1329_v21  ;;  %1350 = vtanh.f32 %v281_v18  ;;  %v313_v18 = vld [vmem:[%s1800_s30 + $0x578] sm:$0xff] }
  0xc9   : > { %v1333_v25 = vpop.eup %1332  ;;  %783 = vst [vmem:[%s1822_s17 + $0x428] sm:$0xff] %v1331_v23  ;;  %1352 = vtanh.f32 %v282_v20  ;;  %v314_v20 = vld [vmem:[%s1800_s30 + $0x580] sm:$0xff] }
  0xca   : > { %v1335_v27 = vpop.eup %1334  ;;  %784 = vst [vmem:[%s1822_s17 + $0x430] sm:$0xff] %v1333_v25  ;;  %1354 = vtanh.f32 %v283_v22  ;;  %v315_v22 = vld [vmem:[%s1800_s30 + $0x588] sm:$0xff] }
  0xcb   : > { %v1337_v29 = vpop.eup %1336  ;;  %785 = vst [vmem:[%s1822_s17 + $0x438] sm:$0xff] %v1335_v27  ;;  %1356 = vtanh.f32 %v284_v24  ;;  %v316_v24 = vld [vmem:[%s1800_s30 + $0x590] sm:$0xff] }
  0xcc   : > { %v1339_v31 = vpop.eup %1338  ;;  %786 = vst [vmem:[%s1822_s17 + $0x440] sm:$0xff] %v1337_v29  ;;  %1358 = vtanh.f32 %v285_v26  ;;  %v317_v26 = vld [vmem:[%s1800_s30 + $0x598] sm:$0xff] }
  0xcd   : > { %v1341_v33 = vpop.eup %1340  ;;  %787 = vst [vmem:[%s1822_s17 + $0x448] sm:$0xff] %v1339_v31  ;;  %1360 = vtanh.f32 %v286_v28  ;;  %v318_v28 = vld [vmem:[%s1800_s30 + $0x5a0] sm:$0xff] }
  0xce   : > { %v1343_v35 = vpop.eup %1342  ;;  %788 = vst [vmem:[%s1822_s17 + $0x450] sm:$0xff] %v1341_v33  ;;  %1362 = vtanh.f32 %v287_v30  ;;  %v319_v30 = vld [vmem:[%s1800_s30 + $0x5a8] sm:$0xff] }
  0xcf   : > { %v1345_v37 = vpop.eup %1344  ;;  %789 = vst [vmem:[%s1822_s17 + $0x458] sm:$0xff] %v1343_v35  ;;  %1364 = vtanh.f32 %v288_v32  ;;  %v320_v32 = vld [vmem:[%s1800_s30 + $0x5b0] sm:$0xff] }
  0xd0   : > { %v1347_v39 = vpop.eup %1346  ;;  %790 = vst [vmem:[%s1822_s17 + $0x460] sm:$0xff] %v1345_v37  ;;  %1366 = vtanh.f32 %v289_v34  ;;  %v321_v34 = vld [vmem:[%s1800_s30 + $0x5b8] sm:$0xff] }
  0xd1   : > { %v1349_v41 = vpop.eup %1348  ;;  %791 = vst [vmem:[%s1822_s17 + $0x468] sm:$0xff] %v1347_v39  ;;  %1368 = vtanh.f32 %v290_v36  ;;  %v322_v36 = vld [vmem:[%s1800_s30 + $0x5c0] sm:$0xff] }
  0xd2   : > { %v1351_v43 = vpop.eup %1350  ;;  %792 = vst [vmem:[%s1822_s17 + $0x470] sm:$0xff] %v1349_v41  ;;  %1370 = vtanh.f32 %v291_v38  ;;  %v323_v38 = vld [vmem:[%s1800_s30 + $0x5c8] sm:$0xff] }
  0xd3   : > { %v1353_v45 = vpop.eup %1352  ;;  %793 = vst [vmem:[%s1822_s17 + $0x478] sm:$0xff] %v1351_v43  ;;  %1372 = vtanh.f32 %v292_v40  ;;  %v324_v40 = vld [vmem:[%s1800_s30 + $0x5d0] sm:$0xff] }
  0xd4   : > { %v1355_v47 = vpop.eup %1354  ;;  %794 = vst [vmem:[%s1822_s17 + $0x480] sm:$0xff] %v1353_v45  ;;  %1374 = vtanh.f32 %v293_v42  ;;  %v325_v42 = vld [vmem:[%s1800_s30 + $0x5d8] sm:$0xff] }
  0xd5   : > { %v1357_v49 = vpop.eup %1356  ;;  %795 = vst [vmem:[%s1822_s17 + $0x488] sm:$0xff] %v1355_v47  ;;  %1376 = vtanh.f32 %v294_v44  ;;  %v326_v44 = vld [vmem:[%s1800_s30 + $0x5e0] sm:$0xff] }
  0xd6   : > { %v1359_v51 = vpop.eup %1358  ;;  %796 = vst [vmem:[%s1822_s17 + $0x490] sm:$0xff] %v1357_v49  ;;  %1378 = vtanh.f32 %v295_v46  ;;  %v327_v46 = vld [vmem:[%s1800_s30 + $0x5e8] sm:$0xff] }
  0xd7   : > { %v1361_v53 = vpop.eup %1360  ;;  %797 = vst [vmem:[%s1822_s17 + $0x498] sm:$0xff] %v1359_v51  ;;  %1380 = vtanh.f32 %v296_v48  ;;  %v328_v48 = vld [vmem:[%s1800_s30 + $0x5f0] sm:$0xff] }
  0xd8   : > { %v1363_v55 = vpop.eup %1362  ;;  %798 = vst [vmem:[%s1822_s17 + $0x4a0] sm:$0xff] %v1361_v53  ;;  %1382 = vtanh.f32 %v297_v50  ;;  %v329_v50 = vld [vmem:[%s1800_s30 + $0x5f8] sm:$0xff] }
  0xd9   : > { %v1365_v57 = vpop.eup %1364  ;;  %799 = vst [vmem:[%s1822_s17 + $0x4a8] sm:$0xff] %v1363_v55  ;;  %1384 = vtanh.f32 %v298_v52  ;;  %v330_v52 = vld [vmem:[%s1800_s30 + $0x600] sm:$0xff] }
  0xda   : > { %v1367_v59 = vpop.eup %1366  ;;  %800 = vst [vmem:[%s1822_s17 + $0x4b0] sm:$0xff] %v1365_v57  ;;  %1386 = vtanh.f32 %v299_v54  ;;  %v331_v54 = vld [vmem:[%s1800_s30 + $0x608] sm:$0xff] }
  0xdb   : > { %v1369_v61 = vpop.eup %1368  ;;  %801 = vst [vmem:[%s1822_s17 + $0x4b8] sm:$0xff] %v1367_v59  ;;  %1388 = vtanh.f32 %v300_v56  ;;  %v332_v56 = vld [vmem:[%s1800_s30 + $0x610] sm:$0xff] }
  0xdc   : > { %v1371_v63 = vpop.eup %1370  ;;  %802 = vst [vmem:[%s1822_s17 + $0x4c0] sm:$0xff] %v1369_v61  ;;  %1390 = vtanh.f32 %v301_v58  ;;  %v333_v58 = vld [vmem:[%s1800_s30 + $0x618] sm:$0xff] }
  0xdd   : > { %v1373_v1 = vpop.eup %1372  ;;  %803 = vst [vmem:[%s1822_s17 + $0x4c8] sm:$0xff] %v1371_v63  ;;  %1392 = vtanh.f32 %v302_v60  ;;  %v334_v60 = vld [vmem:[%s1800_s30 + $0x620] sm:$0xff] }
  0xde   : > { %v1375_v3 = vpop.eup %1374  ;;  %804 = vst [vmem:[%s1822_s17 + $0x4d0] sm:$0xff] %v1373_v1  ;;  %1394 = vtanh.f32 %v303_v62  ;;  %v335_v62 = vld [vmem:[%s1800_s30 + $0x628] sm:$0xff] }
  0xdf   : > { %v1377_v5 = vpop.eup %1376  ;;  %805 = vst [vmem:[%s1822_s17 + $0x4d8] sm:$0xff] %v1375_v3  ;;  %1396 = vtanh.f32 %v304_v0  ;;  %v336_v0 = vld [vmem:[%s1800_s30 + $0x630] sm:$0xff] }
  0xe0   : > { %v1379_v7 = vpop.eup %1378  ;;  %806 = vst [vmem:[%s1822_s17 + $0x4e0] sm:$0xff] %v1377_v5  ;;  %1398 = vtanh.f32 %v305_v2  ;;  %v337_v2 = vld [vmem:[%s1800_s30 + $0x638] sm:$0xff] }
  0xe1   : > { %v1381_v9 = vpop.eup %1380  ;;  %807 = vst [vmem:[%s1822_s17 + $0x4e8] sm:$0xff] %v1379_v7  ;;  %1400 = vtanh.f32 %v306_v4  ;;  %v338_v4 = vld [vmem:[%s1800_s30 + $0x640] sm:$0xff] }
  0xe2   : > { %v1383_v11 = vpop.eup %1382  ;;  %808 = vst [vmem:[%s1822_s17 + $0x4f0] sm:$0xff] %v1381_v9  ;;  %1402 = vtanh.f32 %v307_v6  ;;  %v339_v6 = vld [vmem:[%s1800_s30 + $0x648] sm:$0xff] }
  0xe3   : > { %v1385_v13 = vpop.eup %1384  ;;  %809 = vst [vmem:[%s1822_s17 + $0x4f8] sm:$0xff] %v1383_v11  ;;  %1404 = vtanh.f32 %v308_v8  ;;  %v340_v8 = vld [vmem:[%s1800_s30 + $0x650] sm:$0xff] }
  0xe4   : > { %v1387_v15 = vpop.eup %1386  ;;  %810 = vst [vmem:[%s1822_s17 + $0x500] sm:$0xff] %v1385_v13  ;;  %1406 = vtanh.f32 %v309_v10  ;;  %v341_v10 = vld [vmem:[%s1800_s30 + $0x658] sm:$0xff] }
  0xe5   : > { %v1389_v17 = vpop.eup %1388  ;;  %811 = vst [vmem:[%s1822_s17 + $0x508] sm:$0xff] %v1387_v15  ;;  %1408 = vtanh.f32 %v310_v12  ;;  %v342_v12 = vld [vmem:[%s1800_s30 + $0x660] sm:$0xff] }
  0xe6   : > { %v1391_v19 = vpop.eup %1390  ;;  %812 = vst [vmem:[%s1822_s17 + $0x510] sm:$0xff] %v1389_v17  ;;  %1410 = vtanh.f32 %v311_v14  ;;  %v343_v14 = vld [vmem:[%s1800_s30 + $0x668] sm:$0xff] }
  0xe7   : > { %v1393_v21 = vpop.eup %1392  ;;  %813 = vst [vmem:[%s1822_s17 + $0x518] sm:$0xff] %v1391_v19  ;;  %1412 = vtanh.f32 %v312_v16  ;;  %v344_v16 = vld [vmem:[%s1800_s30 + $0x670] sm:$0xff] }
  0xe8   : > { %v1395_v23 = vpop.eup %1394  ;;  %814 = vst [vmem:[%s1822_s17 + $0x520] sm:$0xff] %v1393_v21  ;;  %1414 = vtanh.f32 %v313_v18  ;;  %v345_v18 = vld [vmem:[%s1800_s30 + $0x678] sm:$0xff] }
  0xe9   : > { %v1397_v25 = vpop.eup %1396  ;;  %815 = vst [vmem:[%s1822_s17 + $0x528] sm:$0xff] %v1395_v23  ;;  %1416 = vtanh.f32 %v314_v20  ;;  %v346_v20 = vld [vmem:[%s1800_s30 + $0x680] sm:$0xff] }
  0xea   : > { %v1399_v27 = vpop.eup %1398  ;;  %816 = vst [vmem:[%s1822_s17 + $0x530] sm:$0xff] %v1397_v25  ;;  %1418 = vtanh.f32 %v315_v22  ;;  %v347_v22 = vld [vmem:[%s1800_s30 + $0x688] sm:$0xff] }
  0xeb   : > { %v1401_v29 = vpop.eup %1400  ;;  %817 = vst [vmem:[%s1822_s17 + $0x538] sm:$0xff] %v1399_v27  ;;  %1420 = vtanh.f32 %v316_v24  ;;  %v348_v24 = vld [vmem:[%s1800_s30 + $0x690] sm:$0xff] }
  0xec   : > { %v1403_v31 = vpop.eup %1402  ;;  %818 = vst [vmem:[%s1822_s17 + $0x540] sm:$0xff] %v1401_v29  ;;  %1422 = vtanh.f32 %v317_v26  ;;  %v349_v26 = vld [vmem:[%s1800_s30 + $0x698] sm:$0xff] }
  0xed   : > { %v1405_v33 = vpop.eup %1404  ;;  %819 = vst [vmem:[%s1822_s17 + $0x548] sm:$0xff] %v1403_v31  ;;  %1424 = vtanh.f32 %v318_v28  ;;  %v350_v28 = vld [vmem:[%s1800_s30 + $0x6a0] sm:$0xff] }
  0xee   : > { %v1407_v35 = vpop.eup %1406  ;;  %820 = vst [vmem:[%s1822_s17 + $0x550] sm:$0xff] %v1405_v33  ;;  %1426 = vtanh.f32 %v319_v30  ;;  %v351_v30 = vld [vmem:[%s1800_s30 + $0x6a8] sm:$0xff] }
  0xef   : > { %v1409_v37 = vpop.eup %1408  ;;  %821 = vst [vmem:[%s1822_s17 + $0x558] sm:$0xff] %v1407_v35  ;;  %1428 = vtanh.f32 %v320_v32  ;;  %v352_v32 = vld [vmem:[%s1800_s30 + $0x6b0] sm:$0xff] }
  0xf0   : > { %v1411_v39 = vpop.eup %1410  ;;  %822 = vst [vmem:[%s1822_s17 + $0x560] sm:$0xff] %v1409_v37  ;;  %1430 = vtanh.f32 %v321_v34  ;;  %v353_v34 = vld [vmem:[%s1800_s30 + $0x6b8] sm:$0xff] }
  0xf1   : > { %v1413_v41 = vpop.eup %1412  ;;  %823 = vst [vmem:[%s1822_s17 + $0x568] sm:$0xff] %v1411_v39  ;;  %1432 = vtanh.f32 %v322_v36  ;;  %v354_v36 = vld [vmem:[%s1800_s30 + $0x6c0] sm:$0xff] }
  0xf2   : > { %v1415_v43 = vpop.eup %1414  ;;  %824 = vst [vmem:[%s1822_s17 + $0x570] sm:$0xff] %v1413_v41  ;;  %1434 = vtanh.f32 %v323_v38  ;;  %v355_v38 = vld [vmem:[%s1800_s30 + $0x6c8] sm:$0xff] }
  0xf3   : > { %v1417_v45 = vpop.eup %1416  ;;  %825 = vst [vmem:[%s1822_s17 + $0x578] sm:$0xff] %v1415_v43  ;;  %1436 = vtanh.f32 %v324_v40  ;;  %v356_v40 = vld [vmem:[%s1800_s30 + $0x6d0] sm:$0xff] }
  0xf4   : > { %v1419_v47 = vpop.eup %1418  ;;  %826 = vst [vmem:[%s1822_s17 + $0x580] sm:$0xff] %v1417_v45  ;;  %1438 = vtanh.f32 %v325_v42  ;;  %v357_v42 = vld [vmem:[%s1800_s30 + $0x6d8] sm:$0xff] }
  0xf5   : > { %v1421_v49 = vpop.eup %1420  ;;  %827 = vst [vmem:[%s1822_s17 + $0x588] sm:$0xff] %v1419_v47  ;;  %1440 = vtanh.f32 %v326_v44  ;;  %v358_v44 = vld [vmem:[%s1800_s30 + $0x6e0] sm:$0xff] }
  0xf6   : > { %v1423_v51 = vpop.eup %1422  ;;  %828 = vst [vmem:[%s1822_s17 + $0x590] sm:$0xff] %v1421_v49  ;;  %1442 = vtanh.f32 %v327_v46  ;;  %v359_v46 = vld [vmem:[%s1800_s30 + $0x6e8] sm:$0xff] }
  0xf7   : > { %v1425_v53 = vpop.eup %1424  ;;  %829 = vst [vmem:[%s1822_s17 + $0x598] sm:$0xff] %v1423_v51  ;;  %1444 = vtanh.f32 %v328_v48  ;;  %v360_v48 = vld [vmem:[%s1800_s30 + $0x6f0] sm:$0xff] }
  0xf8   : > { %v1427_v55 = vpop.eup %1426  ;;  %830 = vst [vmem:[%s1822_s17 + $0x5a0] sm:$0xff] %v1425_v53  ;;  %1446 = vtanh.f32 %v329_v50  ;;  %v361_v50 = vld [vmem:[%s1800_s30 + $0x6f8] sm:$0xff] }
  0xf9   : > { %v1429_v57 = vpop.eup %1428  ;;  %831 = vst [vmem:[%s1822_s17 + $0x5a8] sm:$0xff] %v1427_v55  ;;  %1448 = vtanh.f32 %v330_v52  ;;  %v362_v52 = vld [vmem:[%s1800_s30 + $0x700] sm:$0xff] }
  0xfa   : > { %v1431_v59 = vpop.eup %1430  ;;  %832 = vst [vmem:[%s1822_s17 + $0x5b0] sm:$0xff] %v1429_v57  ;;  %1450 = vtanh.f32 %v331_v54  ;;  %v363_v54 = vld [vmem:[%s1800_s30 + $0x708] sm:$0xff] }
  0xfb   : > { %v1433_v61 = vpop.eup %1432  ;;  %833 = vst [vmem:[%s1822_s17 + $0x5b8] sm:$0xff] %v1431_v59  ;;  %1452 = vtanh.f32 %v332_v56  ;;  %v364_v56 = vld [vmem:[%s1800_s30 + $0x710] sm:$0xff] }
  0xfc   : > { %v1435_v63 = vpop.eup %1434  ;;  %834 = vst [vmem:[%s1822_s17 + $0x5c0] sm:$0xff] %v1433_v61  ;;  %1454 = vtanh.f32 %v333_v58  ;;  %v365_v58 = vld [vmem:[%s1800_s30 + $0x718] sm:$0xff] }
  0xfd   : > { %v1437_v1 = vpop.eup %1436  ;;  %835 = vst [vmem:[%s1822_s17 + $0x5c8] sm:$0xff] %v1435_v63  ;;  %1456 = vtanh.f32 %v334_v60  ;;  %v366_v60 = vld [vmem:[%s1800_s30 + $0x720] sm:$0xff] }
  0xfe   : > { %v1439_v3 = vpop.eup %1438  ;;  %836 = vst [vmem:[%s1822_s17 + $0x5d0] sm:$0xff] %v1437_v1  ;;  %1458 = vtanh.f32 %v335_v62  ;;  %v367_v62 = vld [vmem:[%s1800_s30 + $0x728] sm:$0xff] }
  0xff   : > { %v1441_v5 = vpop.eup %1440  ;;  %837 = vst [vmem:[%s1822_s17 + $0x5d8] sm:$0xff] %v1439_v3  ;;  %1460 = vtanh.f32 %v336_v0  ;;  %v368_v0 = vld [vmem:[%s1800_s30 + $0x730] sm:$0xff] }
 0x100   : > { %v1443_v7 = vpop.eup %1442  ;;  %838 = vst [vmem:[%s1822_s17 + $0x5e0] sm:$0xff] %v1441_v5  ;;  %1462 = vtanh.f32 %v337_v2  ;;  %v369_v2 = vld [vmem:[%s1800_s30 + $0x738] sm:$0xff] }
 0x101   : > { %v1445_v9 = vpop.eup %1444  ;;  %839 = vst [vmem:[%s1822_s17 + $0x5e8] sm:$0xff] %v1443_v7  ;;  %1464 = vtanh.f32 %v338_v4  ;;  %v370_v4 = vld [vmem:[%s1800_s30 + $0x740] sm:$0xff] }
 0x102   : > { %v1447_v11 = vpop.eup %1446  ;;  %840 = vst [vmem:[%s1822_s17 + $0x5f0] sm:$0xff] %v1445_v9  ;;  %1466 = vtanh.f32 %v339_v6  ;;  %v371_v6 = vld [vmem:[%s1800_s30 + $0x748] sm:$0xff] }
 0x103   : > { %v1449_v13 = vpop.eup %1448  ;;  %841 = vst [vmem:[%s1822_s17 + $0x5f8] sm:$0xff] %v1447_v11  ;;  %1468 = vtanh.f32 %v340_v8  ;;  %v372_v8 = vld [vmem:[%s1800_s30 + $0x750] sm:$0xff] }
 0x104   : > { %v1451_v15 = vpop.eup %1450  ;;  %842 = vst [vmem:[%s1822_s17 + $0x600] sm:$0xff] %v1449_v13  ;;  %1470 = vtanh.f32 %v341_v10  ;;  %v373_v10 = vld [vmem:[%s1800_s30 + $0x758] sm:$0xff] }
 0x105   : > { %v1453_v17 = vpop.eup %1452  ;;  %843 = vst [vmem:[%s1822_s17 + $0x608] sm:$0xff] %v1451_v15  ;;  %1472 = vtanh.f32 %v342_v12  ;;  %v374_v12 = vld [vmem:[%s1800_s30 + $0x760] sm:$0xff] }
 0x106   : > { %v1455_v19 = vpop.eup %1454  ;;  %844 = vst [vmem:[%s1822_s17 + $0x610] sm:$0xff] %v1453_v17  ;;  %1474 = vtanh.f32 %v343_v14  ;;  %v375_v14 = vld [vmem:[%s1800_s30 + $0x768] sm:$0xff] }
 0x107   : > { %v1457_v21 = vpop.eup %1456  ;;  %845 = vst [vmem:[%s1822_s17 + $0x618] sm:$0xff] %v1455_v19  ;;  %1476 = vtanh.f32 %v344_v16  ;;  %v376_v16 = vld [vmem:[%s1800_s30 + $0x770] sm:$0xff] }
 0x108   : > { %v1459_v23 = vpop.eup %1458  ;;  %846 = vst [vmem:[%s1822_s17 + $0x620] sm:$0xff] %v1457_v21  ;;  %1478 = vtanh.f32 %v345_v18  ;;  %v377_v18 = vld [vmem:[%s1800_s30 + $0x778] sm:$0xff] }
 0x109   : > { %v1461_v25 = vpop.eup %1460  ;;  %847 = vst [vmem:[%s1822_s17 + $0x628] sm:$0xff] %v1459_v23  ;;  %1480 = vtanh.f32 %v346_v20  ;;  %v378_v20 = vld [vmem:[%s1800_s30 + $0x780] sm:$0xff] }
 0x10a   : > { %v1463_v27 = vpop.eup %1462  ;;  %848 = vst [vmem:[%s1822_s17 + $0x630] sm:$0xff] %v1461_v25  ;;  %1482 = vtanh.f32 %v347_v22  ;;  %v379_v22 = vld [vmem:[%s1800_s30 + $0x788] sm:$0xff] }
 0x10b   : > { %v1465_v29 = vpop.eup %1464  ;;  %849 = vst [vmem:[%s1822_s17 + $0x638] sm:$0xff] %v1463_v27  ;;  %1484 = vtanh.f32 %v348_v24  ;;  %v380_v24 = vld [vmem:[%s1800_s30 + $0x790] sm:$0xff] }
 0x10c   : > { %v1467_v31 = vpop.eup %1466  ;;  %850 = vst [vmem:[%s1822_s17 + $0x640] sm:$0xff] %v1465_v29  ;;  %1486 = vtanh.f32 %v349_v26  ;;  %v381_v26 = vld [vmem:[%s1800_s30 + $0x798] sm:$0xff] }
 0x10d   : > { %v1469_v33 = vpop.eup %1468  ;;  %851 = vst [vmem:[%s1822_s17 + $0x648] sm:$0xff] %v1467_v31  ;;  %1488 = vtanh.f32 %v350_v28  ;;  %v382_v28 = vld [vmem:[%s1800_s30 + $0x7a0] sm:$0xff] }
 0x10e   : > { %v1471_v35 = vpop.eup %1470  ;;  %852 = vst [vmem:[%s1822_s17 + $0x650] sm:$0xff] %v1469_v33  ;;  %1490 = vtanh.f32 %v351_v30  ;;  %v383_v30 = vld [vmem:[%s1800_s30 + $0x7a8] sm:$0xff] }
 0x10f   : > { %v1473_v37 = vpop.eup %1472  ;;  %853 = vst [vmem:[%s1822_s17 + $0x658] sm:$0xff] %v1471_v35  ;;  %1492 = vtanh.f32 %v352_v32  ;;  %v384_v32 = vld [vmem:[%s1800_s30 + $0x7b0] sm:$0xff] }
 0x110   : > { %v1475_v39 = vpop.eup %1474  ;;  %854 = vst [vmem:[%s1822_s17 + $0x660] sm:$0xff] %v1473_v37  ;;  %1494 = vtanh.f32 %v353_v34  ;;  %v385_v34 = vld [vmem:[%s1800_s30 + $0x7b8] sm:$0xff] }
 0x111   : > { %v1477_v41 = vpop.eup %1476  ;;  %855 = vst [vmem:[%s1822_s17 + $0x668] sm:$0xff] %v1475_v39  ;;  %1496 = vtanh.f32 %v354_v36  ;;  %v386_v36 = vld [vmem:[%s1800_s30 + $0x7c0] sm:$0xff] }
 0x112   : > { %v1479_v43 = vpop.eup %1478  ;;  %856 = vst [vmem:[%s1822_s17 + $0x670] sm:$0xff] %v1477_v41  ;;  %1498 = vtanh.f32 %v355_v38  ;;  %v387_v38 = vld [vmem:[%s1800_s30 + $0x7c8] sm:$0xff] }
 0x113   : > { %v1481_v45 = vpop.eup %1480  ;;  %857 = vst [vmem:[%s1822_s17 + $0x678] sm:$0xff] %v1479_v43  ;;  %1500 = vtanh.f32 %v356_v40  ;;  %v388_v40 = vld [vmem:[%s1800_s30 + $0x7d0] sm:$0xff] }
 0x114   : > { %v1483_v47 = vpop.eup %1482  ;;  %858 = vst [vmem:[%s1822_s17 + $0x680] sm:$0xff] %v1481_v45  ;;  %1502 = vtanh.f32 %v357_v42  ;;  %v389_v42 = vld [vmem:[%s1800_s30 + $0x7d8] sm:$0xff] }
 0x115   : > { %v1485_v49 = vpop.eup %1484  ;;  %859 = vst [vmem:[%s1822_s17 + $0x688] sm:$0xff] %v1483_v47  ;;  %1504 = vtanh.f32 %v358_v44  ;;  %v390_v44 = vld [vmem:[%s1800_s30 + $0x7e0] sm:$0xff] }
 0x116   : > { %v1487_v51 = vpop.eup %1486  ;;  %860 = vst [vmem:[%s1822_s17 + $0x690] sm:$0xff] %v1485_v49  ;;  %1506 = vtanh.f32 %v359_v46  ;;  %v391_v46 = vld [vmem:[%s1800_s30 + $0x7e8] sm:$0xff] }
 0x117   : > { %v1489_v53 = vpop.eup %1488  ;;  %861 = vst [vmem:[%s1822_s17 + $0x698] sm:$0xff] %v1487_v51  ;;  %1508 = vtanh.f32 %v360_v48  ;;  %v392_v48 = vld [vmem:[%s1800_s30 + $0x7f0] sm:$0xff] }
 0x118   : > { %v1491_v55 = vpop.eup %1490  ;;  %862 = vst [vmem:[%s1822_s17 + $0x6a0] sm:$0xff] %v1489_v53  ;;  %1510 = vtanh.f32 %v361_v50  ;;  %v393_v50 = vld [vmem:[%s1800_s30 + $0x7f8] sm:$0xff] }
 0x119   : > { %v1493_v57 = vpop.eup %1492  ;;  %863 = vst [vmem:[%s1822_s17 + $0x6a8] sm:$0xff] %v1491_v55  ;;  %1512 = vtanh.f32 %v362_v52 }
 0x11a   : > { %v1495_v59 = vpop.eup %1494  ;;  %864 = vst [vmem:[%s1822_s17 + $0x6b0] sm:$0xff] %v1493_v57  ;;  %1514 = vtanh.f32 %v363_v54 }
 0x11b   : > { %v1497_v61 = vpop.eup %1496  ;;  %865 = vst [vmem:[%s1822_s17 + $0x6b8] sm:$0xff] %v1495_v59  ;;  %1516 = vtanh.f32 %v364_v56 }
 0x11c   : > { %v1499_v63 = vpop.eup %1498  ;;  %866 = vst [vmem:[%s1822_s17 + $0x6c0] sm:$0xff] %v1497_v61  ;;  %1518 = vtanh.f32 %v365_v58 }
 0x11d   : > { %v1501_v1 = vpop.eup %1500  ;;  %867 = vst [vmem:[%s1822_s17 + $0x6c8] sm:$0xff] %v1499_v63  ;;  %1520 = vtanh.f32 %v366_v60 }
 0x11e   : > { %v1503_v3 = vpop.eup %1502  ;;  %868 = vst [vmem:[%s1822_s17 + $0x6d0] sm:$0xff] %v1501_v1  ;;  %1522 = vtanh.f32 %v367_v62 }
 0x11f   : > { %v1505_v5 = vpop.eup %1504  ;;  %869 = vst [vmem:[%s1822_s17 + $0x6d8] sm:$0xff] %v1503_v3  ;;  %1524 = vtanh.f32 %v368_v0 }
 0x120   : > { %v1507_v7 = vpop.eup %1506  ;;  %870 = vst [vmem:[%s1822_s17 + $0x6e0] sm:$0xff] %v1505_v5  ;;  %1526 = vtanh.f32 %v369_v2 }
 0x121   : > { %v1509_v9 = vpop.eup %1508  ;;  %871 = vst [vmem:[%s1822_s17 + $0x6e8] sm:$0xff] %v1507_v7  ;;  %1528 = vtanh.f32 %v370_v4 }
 0x122   : > { %v1511_v11 = vpop.eup %1510  ;;  %872 = vst [vmem:[%s1822_s17 + $0x6f0] sm:$0xff] %v1509_v9  ;;  %1530 = vtanh.f32 %v371_v6 }
 0x123   : > { %v1513_v13 = vpop.eup %1512  ;;  %873 = vst [vmem:[%s1822_s17 + $0x6f8] sm:$0xff] %v1511_v11  ;;  %1532 = vtanh.f32 %v372_v8 }
 0x124   : > { %v1515_v15 = vpop.eup %1514  ;;  %874 = vst [vmem:[%s1822_s17 + $0x700] sm:$0xff] %v1513_v13  ;;  %1534 = vtanh.f32 %v373_v10 }
 0x125   : > { %v1517_v17 = vpop.eup %1516  ;;  %875 = vst [vmem:[%s1822_s17 + $0x708] sm:$0xff] %v1515_v15  ;;  %1536 = vtanh.f32 %v374_v12 }
 0x126   : > { %v1519_v19 = vpop.eup %1518  ;;  %876 = vst [vmem:[%s1822_s17 + $0x710] sm:$0xff] %v1517_v17  ;;  %1538 = vtanh.f32 %v375_v14 }
 0x127   : > { %v1521_v21 = vpop.eup %1520  ;;  %877 = vst [vmem:[%s1822_s17 + $0x718] sm:$0xff] %v1519_v19  ;;  %1540 = vtanh.f32 %v376_v16 }
 0x128   : > { %v1523_v23 = vpop.eup %1522  ;;  %878 = vst [vmem:[%s1822_s17 + $0x720] sm:$0xff] %v1521_v21  ;;  %1542 = vtanh.f32 %v377_v18 }
 0x129   : > { %v1525_v25 = vpop.eup %1524  ;;  %879 = vst [vmem:[%s1822_s17 + $0x728] sm:$0xff] %v1523_v23  ;;  %1544 = vtanh.f32 %v378_v20 }
 0x12a   : > { %v1527_v27 = vpop.eup %1526  ;;  %880 = vst [vmem:[%s1822_s17 + $0x730] sm:$0xff] %v1525_v25  ;;  %1546 = vtanh.f32 %v379_v22 }
 0x12b   : > { %v1529_v29 = vpop.eup %1528  ;;  %881 = vst [vmem:[%s1822_s17 + $0x738] sm:$0xff] %v1527_v27  ;;  %1548 = vtanh.f32 %v380_v24 }
 0x12c   : > { %v1531_v31 = vpop.eup %1530  ;;  %882 = vst [vmem:[%s1822_s17 + $0x740] sm:$0xff] %v1529_v29  ;;  %1550 = vtanh.f32 %v381_v26 }
 0x12d   : > { %v1533_v33 = vpop.eup %1532  ;;  %883 = vst [vmem:[%s1822_s17 + $0x748] sm:$0xff] %v1531_v31  ;;  %1552 = vtanh.f32 %v382_v28 }
 0x12e   : > { %v1535_v35 = vpop.eup %1534  ;;  %884 = vst [vmem:[%s1822_s17 + $0x750] sm:$0xff] %v1533_v33  ;;  %1554 = vtanh.f32 %v383_v30 }
 0x12f   : > { %v1537_v37 = vpop.eup %1536  ;;  %885 = vst [vmem:[%s1822_s17 + $0x758] sm:$0xff] %v1535_v35  ;;  %1556 = vtanh.f32 %v384_v32 }
 0x130   : > { %v1539_v39 = vpop.eup %1538  ;;  %886 = vst [vmem:[%s1822_s17 + $0x760] sm:$0xff] %v1537_v37  ;;  %1558 = vtanh.f32 %v385_v34 }
 0x131   : > { %v1541_v41 = vpop.eup %1540  ;;  %887 = vst [vmem:[%s1822_s17 + $0x768] sm:$0xff] %v1539_v39  ;;  %1560 = vtanh.f32 %v386_v36 }
 0x132   : > { %v1543_v43 = vpop.eup %1542  ;;  %888 = vst [vmem:[%s1822_s17 + $0x770] sm:$0xff] %v1541_v41  ;;  %1562 = vtanh.f32 %v387_v38 }
 0x133   : > { %v1545_v45 = vpop.eup %1544  ;;  %889 = vst [vmem:[%s1822_s17 + $0x778] sm:$0xff] %v1543_v43  ;;  %1564 = vtanh.f32 %v388_v40 }
 0x134   : > { %v1547_v47 = vpop.eup %1546  ;;  %890 = vst [vmem:[%s1822_s17 + $0x780] sm:$0xff] %v1545_v45  ;;  %1566 = vtanh.f32 %v389_v42 }
 0x135   : > { %v1549_v49 = vpop.eup %1548  ;;  %891 = vst [vmem:[%s1822_s17 + $0x788] sm:$0xff] %v1547_v47  ;;  %1568 = vtanh.f32 %v390_v44 }
 0x136   : > { %v1551_v51 = vpop.eup %1550  ;;  %892 = vst [vmem:[%s1822_s17 + $0x790] sm:$0xff] %v1549_v49  ;;  %1570 = vtanh.f32 %v391_v46 }
 0x137   : > { %v1553_v52 = vpop.eup %1552  ;;  %893 = vst [vmem:[%s1822_s17 + $0x798] sm:$0xff] %v1551_v51  ;;  %1572 = vtanh.f32 %v392_v48 }
 0x138   : > { %v1555_v53 = vpop.eup %1554  ;;  %894 = vst [vmem:[%s1822_s17 + $0x7a0] sm:$0xff] %v1553_v52  ;;  %1574 = vtanh.f32 %v393_v50 }
 0x139   : > { %v1557_v54 = vpop.eup %1556  ;;  %895 = vst [vmem:[%s1822_s17 + $0x7a8] sm:$0xff] %v1555_v53 }
 0x13a   : > { %v1559_v55 = vpop.eup %1558  ;;  %896 = vst [vmem:[%s1822_s17 + $0x7b0] sm:$0xff] %v1557_v54 }
 0x13b   : > { %v1561_v56 = vpop.eup %1560  ;;  %897 = vst [vmem:[%s1822_s17 + $0x7b8] sm:$0xff] %v1559_v55 }
 0x13c   : > { %v1563_v57 = vpop.eup %1562  ;;  %898 = vst [vmem:[%s1822_s17 + $0x7c0] sm:$0xff] %v1561_v56 }
 0x13d   : > { %v1565_v58 = vpop.eup %1564  ;;  %899 = vst [vmem:[%s1822_s17 + $0x7c8] sm:$0xff] %v1563_v57 }
 0x13e   : > { %v1567_v59 = vpop.eup %1566  ;;  %900 = vst [vmem:[%s1822_s17 + $0x7d0] sm:$0xff] %v1565_v58 }
 0x13f   : > { %v1569_v60 = vpop.eup %1568  ;;  %901 = vst [vmem:[%s1822_s17 + $0x7d8] sm:$0xff] %v1567_v59 }
 0x140   : > { %v1571_v61 = vpop.eup %1570  ;;  %902 = vst [vmem:[%s1822_s17 + $0x7e0] sm:$0xff] %v1569_v60 }
 0x141   : > { %v1573_v62 = vpop.eup %1572  ;;  %903 = vst [vmem:[%s1822_s17 + $0x7e8] sm:$0xff] %v1571_v61 }
 0x142   : > { %v1575_v63 = vpop.eup %1574  ;;  %904 = vst [vmem:[%s1822_s17 + $0x7f0] sm:$0xff] %v1573_v62 }
 0x143   : > { %905 = vst [vmem:[%s1822_s17 + $0x7f8] sm:$0xff] %v1575_v63 }
 0x144   : > { %1619 = shalt.err (!%p1616_p2)
}
 0x145   : > { %s1620_s13 = scalar_lea.hbm %s2324_s2, 32768  ;;  %s1624_s20 = scalar_lea.hbm %s2374_s1, 65536 }
 0x146   : > { %p1621_p4 = scmp.ne.s32.totalorder %s2324_s2, %s1620_s13  ;;  %p1625_p9 = scmp.lt.u32.totalorder %s2324_s2, %s2374_s1 }
 0x147   : > { %p1626_p1 = scmp.lt.u32.totalorder %s1624_s20, %s1620_s13  ;;  %p1628_p6 = scmp.lt.u32.totalorder %s1620_s13, %s2324_s2 }
 0x148   : > { %p1622_p5 = pnand %p1621_p4, %p2381_p11 }
 0x149   : > { %p1627_p3 = por %p1626_p1, %p1625_p9 }
 0x14a   : > { %p1623_p7 = pneg %p1622_p5 }
 0x14b   : > { %p1629_p12 = por %p1628_p6, %p1627_p3 }
 0x14d   : > { %p1630_p13 = pnand %p1629_p12, %p1623_p7 }
 0x14f   : > { %1633 = shalt.err (!%p1630_p13)
}
 0x150   : > { %s1678_s24 = smov 1024   ;;  %s1679_s26 = smov 64  }
 0x151   : > { %1016 = dma.vmem_to_hbm [thread:$0]  (%p2381_p11), %s2326_s27, 32768, %s2324_s2, %s907_s10, %s1678_s24, %s1678_s24, %s1679_s26  }
 0x152 PF: > { %s936_s30 = sand.u32 1, %s1660_s6   ;;  %p2382_p8 = scmp.ne.s32.totalorder %s2379_s19, 0 }
 0x153   : > { %p2383_p10 = scmp.ge.s32.totalorder %s1672_s9, 2  ;;  %s937_s17 = scalar_lea.sflag [#allocation4], %s936_s30 }
 0x155   : > { %p1023_p0 = pnand %p2383_p10, %p2382_p8 }
 0x157   : > { %1655 = dma.done.wait (!%p1023_p0), %s937_s17, 32768  }
 0x158   : > { %1657 = vsyncadd (!%p1023_p0), %s937_s17, 4294934528  ;;  %p14_p2 = scmp.ge.s32.totalorder %s1715_s12, 4   ;;  %s2384_s6 = smov %s1664_s7 }
 0x159   : > { %s2385_s7 = smov %s1668_s8  ;;  %s2386_s8 = smov %s1727_s15 }
 0x15a   : > { %s2387_s9 = smov %s1715_s12  ;;  %16 = sbr.rel (!%p14_p2) target bundleno = 5 (0x5), region = 69 }
 0x161   :  { %942 = vsyncpa [#allocation3], 1 }
 0x162   :  { %944 = vsyncpa [#allocation3 + $0x1], 1 }
 0x163   :  { %945 = vsyncpa [#allocation4], 1 }
 0x164   :  { %947 = vsyncpa [#allocation4 + $0x1], 1 }

</bundles_post_ra>
